<compile_context>
chip_gen: v7x
topology: tpu7x:2x2x1
jax: 0.10.0
libtpu: 0.0.40
codegen_flags: <defaults>
</compile_context>

<pallas_src>
import jax
import jax.numpy as jnp
from jax.experimental import pallas as pl
from jax.experimental.pallas import tpu as pltpu


SUBLANES = 8
LANES = 128
EDGES_PER_BLOCK = SUBLANES * LANES  # 1024 edges per grid step


def _u_dot_v_kernel(src_ref, dst_ref, ht_ref, out_ref):
    # src_ref, dst_ref : (8, 128) int32 edge-endpoint ids for this block
    # ht_ref           : (D, N) float32, h transposed, resident in VMEM
    # out_ref          : (8, 128) float32 logits for this block
    ht = ht_ref[...]                                   # (D, N)
    n_nodes = ht.shape[1]
    # Hoisted once per block (broadcasts are not CSE'd).
    node_iota = jax.lax.broadcasted_iota(jnp.int32, (n_nodes, LANES), 0)

    # Static unrolled loop: 8 lane-rows of 128 edges each.
    for r in range(SUBLANES):
        src = src_ref[pl.ds(r, 1), :]                  # (1, 128)
        dst = dst_ref[pl.ds(r, 1), :]                  # (1, 128)
        oh_src = (node_iota == src).astype(jnp.float32)   # (N, 128) one-hot
        oh_dst = (node_iota == dst).astype(jnp.float32)   # (N, 128) one-hot
        # Gather via MXU: h^T (D, N) @ one-hot (N, 128) -> (D, 128)
        hu = jnp.dot(ht, oh_src,
                     preferred_element_type=jnp.float32,
                     precision=jax.lax.Precision.HIGHEST)
        hv = jnp.dot(ht, oh_dst,
                     preferred_element_type=jnp.float32,
                     precision=jax.lax.Precision.HIGHEST)
        # Reduce over D (sublane axis) -> lane-dense (1, 128) row store.
        out_ref[pl.ds(r, 1), :] = jnp.sum(hu * hv, axis=0, keepdims=True)


def decoder_forward(src_ids, dst_ids, node_representations):
    """Pallas equivalent of Decoder.forward.

    Args:
      src_ids: int32 [E] source node id per edge.
      dst_ids: int32 [E] destination node id per edge.
      node_representations: [N, D] float array (h).
    Returns:
      logits: [E, 1] array, logits[e] = dot(h[src[e]], h[dst[e]]).
    """
    E = int(src_ids.shape[0])
    N, D = node_representations.shape

    nblk = pl.cdiv(E, EDGES_PER_BLOCK)
    e_pad = nblk * EDGES_PER_BLOCK
    pad = e_pad - E

    # Pad edge lists to a whole number of (8, 128) blocks; pad ids point at
    # node 0 (always valid) and the corresponding logits are sliced off below.
    src_p = jnp.pad(src_ids.astype(jnp.int32), (0, pad)).reshape(
        nblk * SUBLANES, LANES)
    dst_p = jnp.pad(dst_ids.astype(jnp.int32), (0, pad)).reshape(
        nblk * SUBLANES, LANES)
    # Wrapper-side layout plumbing: present h transposed so the in-kernel
    # gather matmul needs no transpose and the reduction lands lane-dense.
    ht = jnp.asarray(node_representations, jnp.float32).T        # (D, N)

    out = pl.pallas_call(
        _u_dot_v_kernel,
        out_shape=jax.ShapeDtypeStruct((nblk * SUBLANES, LANES), jnp.float32),
        grid_spec=pltpu.PrefetchScalarGridSpec(
            num_scalar_prefetch=0,
            grid=(nblk,),
            in_specs=[
                pl.BlockSpec((SUBLANES, LANES), lambda i: (i, 0)),   # src ids
                pl.BlockSpec((SUBLANES, LANES), lambda i: (i, 0)),   # dst ids
                pl.BlockSpec((D, N), lambda i: (0, 0)),              # h^T resident
            ],
            out_specs=pl.BlockSpec((SUBLANES, LANES), lambda i: (i, 0)),
        ),
        compiler_params=pltpu.CompilerParams(
            dimension_semantics=("parallel",)),
    )(src_p, dst_p, ht)

    logits = out.reshape(e_pad, 1)[:E]
    return logits.astype(node_representations.dtype)


if __name__ == "__main__":
    key = jax.random.PRNGKey(0)
    k_h, k_src, k_dst = jax.random.split(key, 3)

    N = 8    # number of nodes
    D = 32   # node representation width
    E = 16   # number of edges

    h = jax.random.normal(k_h, (N, D), dtype=jnp.float32)
    src_ids = jax.random.randint(k_src, (E,), 0, N, dtype=jnp.int32)
    dst_ids = jax.random.randint(k_dst, (E,), 0, N, dtype=jnp.int32)

    logits = decoder_forward(src_ids, dst_ids, h)
    logits = jax.block_until_ready(logits)

    # pure-JAX reference: u_dot_v
    ref = jnp.sum(h[src_ids] * h[dst_ids], axis=-1, keepdims=True)
    assert logits.shape == (E, 1), logits.shape
    assert jnp.allclose(logits, ref, atol=1e-4, rtol=1e-4), (logits, ref)

    print("KERNEL_OK")
</pallas_src>

<mosaic_0001>
module attributes {stable_mosaic.version = 11 : i64} {
  func.func @_u_dot_v_kernel(%arg0: i32, %arg1: memref<8x128xi32, #tpu.memory_space<vmem>>, %arg2: memref<8x128xi32, #tpu.memory_space<vmem>>, %arg3: memref<32x8xf32, #tpu.memory_space<vmem>>, %arg4: memref<8x128xf32, #tpu.memory_space<vmem>>) attributes {dimension_semantics = [#tpu.dimension_semantics<parallel>], iteration_bounds = array<i64: 1>, scalar_prefetch = 0 : i64, scratch_operands = 0 : i64, tpu.core_type = #tpu.core_type<tc>, window_params = [{transform_indices = @transform_0, window_bounds = array<i64: 8, 128>}, {transform_indices = @transform_1, window_bounds = array<i64: 8, 128>}, {pipeline_mode = #tpu.pipeline_mode<synchronous>, transform_indices = @transform_2, window_bounds = array<i64: 32, 8>}, {transform_indices = @transform_3, window_bounds = array<i64: 8, 128>}]} {
    %c0 = arith.constant 0 : index
    %c0_0 = arith.constant 0 : index
    %0 = vector.load %arg3[%c0, %c0_0] : memref<32x8xf32, #tpu.memory_space<vmem>>, vector<32x8xf32>
    %1 = tpu.iota {dimensions = array<i32: 0>} : vector<8x128xi32>
    %c0_1 = arith.constant 0 : index
    %c0_2 = arith.constant 0 : index
    %2 = vector.load %arg1[%c0_1, %c0_2] : memref<8x128xi32, #tpu.memory_space<vmem>>, vector<1x128xi32>
    %c0_3 = arith.constant 0 : index
    %c0_4 = arith.constant 0 : index
    %3 = vector.load %arg2[%c0_3, %c0_4] : memref<8x128xi32, #tpu.memory_space<vmem>>, vector<1x128xi32>
    %4 = vector.broadcast %2 : vector<1x128xi32> to vector<8x128xi32>
    %5 = arith.cmpi eq, %1, %4 : vector<8x128xi32>
    %6 = arith.extui %5 : vector<8x128xi1> to vector<8x128xi32>
    %7 = arith.sitofp %6 : vector<8x128xi32> to vector<8x128xf32>
    %8 = vector.broadcast %3 : vector<1x128xi32> to vector<8x128xi32>
    %9 = arith.cmpi eq, %1, %8 : vector<8x128xi32>
    %10 = arith.extui %9 : vector<8x128xi1> to vector<8x128xi32>
    %11 = arith.sitofp %10 : vector<8x128xi32> to vector<8x128xf32>
    %cst = arith.constant dense<0.000000e+00> : vector<32x128xf32>
    %12 = tpu.matmul %0, %7, %cst {dimension_numbers = #tpu.dot_dimension_numbers<[1], [0], [0], [1], [0, 0, 1, 1], [], []>, precision = #tpu.contract_precision<fp32>} : vector<32x8xf32>, vector<8x128xf32>, vector<32x128xf32> -> vector<32x128xf32>
    %cst_5 = arith.constant dense<0.000000e+00> : vector<32x128xf32>
    %13 = tpu.matmul %0, %11, %cst_5 {dimension_numbers = #tpu.dot_dimension_numbers<[1], [0], [0], [1], [0, 0, 1, 1], [], []>, precision = #tpu.contract_precision<fp32>} : vector<32x8xf32>, vector<8x128xf32>, vector<32x128xf32> -> vector<32x128xf32>
    %14 = arith.mulf %12, %13 : vector<32x128xf32>
    %cst_6 = arith.constant dense<0.000000e+00> : vector<128xf32>
    %15 = vector.multi_reduction <add>, %14, %cst_6 [0] : vector<32x128xf32> to vector<128xf32>
    %16 = vector.shape_cast %15 : vector<128xf32> to vector<1x128xf32>
    %c0_7 = arith.constant 0 : index
    %c0_8 = arith.constant 0 : index
    %17 = vector.load %arg4[%c0_7, %c0_8] : memref<8x128xf32, #tpu.memory_space<vmem>>, vector<1x128xf32>
    tpu.vector_store %arg4[%c0_7, %c0_8], %16 {strides = array<i32>} : memref<8x128xf32, #tpu.memory_space<vmem>>, vector<1x128xf32>,
    %c1 = arith.constant 1 : index
    %c0_9 = arith.constant 0 : index
    %18 = vector.load %arg1[%c1, %c0_9] : memref<8x128xi32, #tpu.memory_space<vmem>>, vector<1x128xi32>
    %c1_10 = arith.constant 1 : index
    %c0_11 = arith.constant 0 : index
    %19 = vector.load %arg2[%c1_10, %c0_11] : memref<8x128xi32, #tpu.memory_space<vmem>>, vector<1x128xi32>
    %20 = vector.broadcast %18 : vector<1x128xi32> to vector<8x128xi32>
    %21 = arith.cmpi eq, %1, %20 : vector<8x128xi32>
    %22 = arith.extui %21 : vector<8x128xi1> to vector<8x128xi32>
    %23 = arith.sitofp %22 : vector<8x128xi32> to vector<8x128xf32>
    %24 = vector.broadcast %19 : vector<1x128xi32> to vector<8x128xi32>
    %25 = arith.cmpi eq, %1, %24 : vector<8x128xi32>
    %26 = arith.extui %25 : vector<8x128xi1> to vector<8x128xi32>
    %27 = arith.sitofp %26 : vector<8x128xi32> to vector<8x128xf32>
    %cst_12 = arith.constant dense<0.000000e+00> : vector<32x128xf32>
    %28 = tpu.matmul %0, %23, %cst_12 {dimension_numbers = #tpu.dot_dimension_numbers<[1], [0], [0], [1], [0, 0, 1, 1], [], []>, precision = #tpu.contract_precision<fp32>} : vector<32x8xf32>, vector<8x128xf32>, vector<32x128xf32> -> vector<32x128xf32>
    %cst_13 = arith.constant dense<0.000000e+00> : vector<32x128xf32>
    %29 = tpu.matmul %0, %27, %cst_13 {dimension_numbers = #tpu.dot_dimension_numbers<[1], [0], [0], [1], [0, 0, 1, 1], [], []>, precision = #tpu.contract_precision<fp32>} : vector<32x8xf32>, vector<8x128xf32>, vector<32x128xf32> -> vector<32x128xf32>
    %30 = arith.mulf %28, %29 : vector<32x128xf32>
    %cst_14 = arith.constant dense<0.000000e+00> : vector<128xf32>
    %31 = vector.multi_reduction <add>, %30, %cst_14 [0] : vector<32x128xf32> to vector<128xf32>
    %32 = vector.shape_cast %31 : vector<128xf32> to vector<1x128xf32>
    %c1_15 = arith.constant 1 : index
    %c0_16 = arith.constant 0 : index
    %33 = vector.load %arg4[%c1_15, %c0_16] : memref<8x128xf32, #tpu.memory_space<vmem>>, vector<1x128xf32>
    tpu.vector_store %arg4[%c1_15, %c0_16], %32 {strides = array<i32>} : memref<8x128xf32, #tpu.memory_space<vmem>>, vector<1x128xf32>,
    %c2 = arith.constant 2 : index
    %c0_17 = arith.constant 0 : index
    %34 = vector.load %arg1[%c2, %c0_17] : memref<8x128xi32, #tpu.memory_space<vmem>>, vector<1x128xi32>
    %c2_18 = arith.constant 2 : index
    %c0_19 = arith.constant 0 : index
    %35 = vector.load %arg2[%c2_18, %c0_19] : memref<8x128xi32, #tpu.memory_space<vmem>>, vector<1x128xi32>
    %36 = vector.broadcast %34 : vector<1x128xi32> to vector<8x128xi32>
    %37 = arith.cmpi eq, %1, %36 : vector<8x128xi32>
    %38 = arith.extui %37 : vector<8x128xi1> to vector<8x128xi32>
    %39 = arith.sitofp %38 : vector<8x128xi32> to vector<8x128xf32>
    %40 = vector.broadcast %35 : vector<1x128xi32> to vector<8x128xi32>
    %41 = arith.cmpi eq, %1, %40 : vector<8x128xi32>
    %42 = arith.extui %41 : vector<8x128xi1> to vector<8x128xi32>
    %43 = arith.sitofp %42 : vector<8x128xi32> to vector<8x128xf32>
    %cst_20 = arith.constant dense<0.000000e+00> : vector<32x128xf32>
    %44 = tpu.matmul %0, %39, %cst_20 {dimension_numbers = #tpu.dot_dimension_numbers<[1], [0], [0], [1], [0, 0, 1, 1], [], []>, precision = #tpu.contract_precision<fp32>} : vector<32x8xf32>, vector<8x128xf32>, vector<32x128xf32> -> vector<32x128xf32>
    %cst_21 = arith.constant dense<0.000000e+00> : vector<32x128xf32>
    %45 = tpu.matmul %0, %43, %cst_21 {dimension_numbers = #tpu.dot_dimension_numbers<[1], [0], [0], [1], [0, 0, 1, 1], [], []>, precision = #tpu.contract_precision<fp32>} : vector<32x8xf32>, vector<8x128xf32>, vector<32x128xf32> -> vector<32x128xf32>
    %46 = arith.mulf %44, %45 : vector<32x128xf32>
    %cst_22 = arith.constant dense<0.000000e+00> : vector<128xf32>
    %47 = vector.multi_reduction <add>, %46, %cst_22 [0] : vector<32x128xf32> to vector<128xf32>
    %48 = vector.shape_cast %47 : vector<128xf32> to vector<1x128xf32>
    %c2_23 = arith.constant 2 : index
    %c0_24 = arith.constant 0 : index
    %49 = vector.load %arg4[%c2_23, %c0_24] : memref<8x128xf32, #tpu.memory_space<vmem>>, vector<1x128xf32>
    tpu.vector_store %arg4[%c2_23, %c0_24], %48 {strides = array<i32>} : memref<8x128xf32, #tpu.memory_space<vmem>>, vector<1x128xf32>,
    %c3 = arith.constant 3 : index
    %c0_25 = arith.constant 0 : index
    %50 = vector.load %arg1[%c3, %c0_25] : memref<8x128xi32, #tpu.memory_space<vmem>>, vector<1x128xi32>
    %c3_26 = arith.constant 3 : index
    %c0_27 = arith.constant 0 : index
    %51 = vector.load %arg2[%c3_26, %c0_27] : memref<8x128xi32, #tpu.memory_space<vmem>>, vector<1x128xi32>
    %52 = vector.broadcast %50 : vector<1x128xi32> to vector<8x128xi32>
    %53 = arith.cmpi eq, %1, %52 : vector<8x128xi32>
    %54 = arith.extui %53 : vector<8x128xi1> to vector<8x128xi32>
    %55 = arith.sitofp %54 : vector<8x128xi32> to vector<8x128xf32>
    %56 = vector.broadcast %51 : vector<1x128xi32> to vector<8x128xi32>
    %57 = arith.cmpi eq, %1, %56 : vector<8x128xi32>
    %58 = arith.extui %57 : vector<8x128xi1> to vector<8x128xi32>
    %59 = arith.sitofp %58 : vector<8x128xi32> to vector<8x128xf32>
    %cst_28 = arith.constant dense<0.000000e+00> : vector<32x128xf32>
    %60 = tpu.matmul %0, %55, %cst_28 {dimension_numbers = #tpu.dot_dimension_numbers<[1], [0], [0], [1], [0, 0, 1, 1], [], []>, precision = #tpu.contract_precision<fp32>} : vector<32x8xf32>, vector<8x128xf32>, vector<32x128xf32> -> vector<32x128xf32>
    %cst_29 = arith.constant dense<0.000000e+00> : vector<32x128xf32>
    %61 = tpu.matmul %0, %59, %cst_29 {dimension_numbers = #tpu.dot_dimension_numbers<[1], [0], [0], [1], [0, 0, 1, 1], [], []>, precision = #tpu.contract_precision<fp32>} : vector<32x8xf32>, vector<8x128xf32>, vector<32x128xf32> -> vector<32x128xf32>
    %62 = arith.mulf %60, %61 : vector<32x128xf32>
    %cst_30 = arith.constant dense<0.000000e+00> : vector<128xf32>
    %63 = vector.multi_reduction <add>, %62, %cst_30 [0] : vector<32x128xf32> to vector<128xf32>
    %64 = vector.shape_cast %63 : vector<128xf32> to vector<1x128xf32>
    %c3_31 = arith.constant 3 : index
    %c0_32 = arith.constant 0 : index
    %65 = vector.load %arg4[%c3_31, %c0_32] : memref<8x128xf32, #tpu.memory_space<vmem>>, vector<1x128xf32>
    tpu.vector_store %arg4[%c3_31, %c0_32], %64 {strides = array<i32>} : memref<8x128xf32, #tpu.memory_space<vmem>>, vector<1x128xf32>,
    %c4 = arith.constant 4 : index
    %c0_33 = arith.constant 0 : index
    %66 = vector.load %arg1[%c4, %c0_33] : memref<8x128xi32, #tpu.memory_space<vmem>>, vector<1x128xi32>
    %c4_34 = arith.constant 4 : index
    %c0_35 = arith.constant 0 : index
    %67 = vector.load %arg2[%c4_34, %c0_35] : memref<8x128xi32, #tpu.memory_space<vmem>>, vector<1x128xi32>
    %68 = vector.broadcast %66 : vector<1x128xi32> to vector<8x128xi32>
    %69 = arith.cmpi eq, %1, %68 : vector<8x128xi32>
    %70 = arith.extui %69 : vector<8x128xi1> to vector<8x128xi32>
    %71 = arith.sitofp %70 : vector<8x128xi32> to vector<8x128xf32>
    %72 = vector.broadcast %67 : vector<1x128xi32> to vector<8x128xi32>
    %73 = arith.cmpi eq, %1, %72 : vector<8x128xi32>
    %74 = arith.extui %73 : vector<8x128xi1> to vector<8x128xi32>
    %75 = arith.sitofp %74 : vector<8x128xi32> to vector<8x128xf32>
    %cst_36 = arith.constant dense<0.000000e+00> : vector<32x128xf32>
    %76 = tpu.matmul %0, %71, %cst_36 {dimension_numbers = #tpu.dot_dimension_numbers<[1], [0], [0], [1], [0, 0, 1, 1], [], []>, precision = #tpu.contract_precision<fp32>} : vector<32x8xf32>, vector<8x128xf32>, vector<32x128xf32> -> vector<32x128xf32>
    %cst_37 = arith.constant dense<0.000000e+00> : vector<32x128xf32>
    %77 = tpu.matmul %0, %75, %cst_37 {dimension_numbers = #tpu.dot_dimension_numbers<[1], [0], [0], [1], [0, 0, 1, 1], [], []>, precision = #tpu.contract_precision<fp32>} : vector<32x8xf32>, vector<8x128xf32>, vector<32x128xf32> -> vector<32x128xf32>
    %78 = arith.mulf %76, %77 : vector<32x128xf32>
    %cst_38 = arith.constant dense<0.000000e+00> : vector<128xf32>
    %79 = vector.multi_reduction <add>, %78, %cst_38 [0] : vector<32x128xf32> to vector<128xf32>
    %80 = vector.shape_cast %79 : vector<128xf32> to vector<1x128xf32>
    %c4_39 = arith.constant 4 : index
    %c0_40 = arith.constant 0 : index
    %81 = vector.load %arg4[%c4_39, %c0_40] : memref<8x128xf32, #tpu.memory_space<vmem>>, vector<1x128xf32>
    tpu.vector_store %arg4[%c4_39, %c0_40], %80 {strides = array<i32>} : memref<8x128xf32, #tpu.memory_space<vmem>>, vector<1x128xf32>,
    %c5 = arith.constant 5 : index
    %c0_41 = arith.constant 0 : index
    %82 = vector.load %arg1[%c5, %c0_41] : memref<8x128xi32, #tpu.memory_space<vmem>>, vector<1x128xi32>
    %c5_42 = arith.constant 5 : index
    %c0_43 = arith.constant 0 : index
    %83 = vector.load %arg2[%c5_42, %c0_43] : memref<8x128xi32, #tpu.memory_space<vmem>>, vector<1x128xi32>
    %84 = vector.broadcast %82 : vector<1x128xi32> to vector<8x128xi32>
    %85 = arith.cmpi eq, %1, %84 : vector<8x128xi32>
    %86 = arith.extui %85 : vector<8x128xi1> to vector<8x128xi32>
    %87 = arith.sitofp %86 : vector<8x128xi32> to vector<8x128xf32>
    %88 = vector.broadcast %83 : vector<1x128xi32> to vector<8x128xi32>
    %89 = arith.cmpi eq, %1, %88 : vector<8x128xi32>
    %90 = arith.extui %89 : vector<8x128xi1> to vector<8x128xi32>
    %91 = arith.sitofp %90 : vector<8x128xi32> to vector<8x128xf32>
    %cst_44 = arith.constant dense<0.000000e+00> : vector<32x128xf32>
    %92 = tpu.matmul %0, %87, %cst_44 {dimension_numbers = #tpu.dot_dimension_numbers<[1], [0], [0], [1], [0, 0, 1, 1], [], []>, precision = #tpu.contract_precision<fp32>} : vector<32x8xf32>, vector<8x128xf32>, vector<32x128xf32> -> vector<32x128xf32>
    %cst_45 = arith.constant dense<0.000000e+00> : vector<32x128xf32>
    %93 = tpu.matmul %0, %91, %cst_45 {dimension_numbers = #tpu.dot_dimension_numbers<[1], [0], [0], [1], [0, 0, 1, 1], [], []>, precision = #tpu.contract_precision<fp32>} : vector<32x8xf32>, vector<8x128xf32>, vector<32x128xf32> -> vector<32x128xf32>
    %94 = arith.mulf %92, %93 : vector<32x128xf32>
    %cst_46 = arith.constant dense<0.000000e+00> : vector<128xf32>
    %95 = vector.multi_reduction <add>, %94, %cst_46 [0] : vector<32x128xf32> to vector<128xf32>
    %96 = vector.shape_cast %95 : vector<128xf32> to vector<1x128xf32>
    %c5_47 = arith.constant 5 : index
    %c0_48 = arith.constant 0 : index
    %97 = vector.load %arg4[%c5_47, %c0_48] : memref<8x128xf32, #tpu.memory_space<vmem>>, vector<1x128xf32>
    tpu.vector_store %arg4[%c5_47, %c0_48], %96 {strides = array<i32>} : memref<8x128xf32, #tpu.memory_space<vmem>>, vector<1x128xf32>,
    %c6 = arith.constant 6 : index
    %c0_49 = arith.constant 0 : index
    %98 = vector.load %arg1[%c6, %c0_49] : memref<8x128xi32, #tpu.memory_space<vmem>>, vector<1x128xi32>
    %c6_50 = arith.constant 6 : index
    %c0_51 = arith.constant 0 : index
    %99 = vector.load %arg2[%c6_50, %c0_51] : memref<8x128xi32, #tpu.memory_space<vmem>>, vector<1x128xi32>
    %100 = vector.broadcast %98 : vector<1x128xi32> to vector<8x128xi32>
    %101 = arith.cmpi eq, %1, %100 : vector<8x128xi32>
    %102 = arith.extui %101 : vector<8x128xi1> to vector<8x128xi32>
    %103 = arith.sitofp %102 : vector<8x128xi32> to vector<8x128xf32>
    %104 = vector.broadcast %99 : vector<1x128xi32> to vector<8x128xi32>
    %105 = arith.cmpi eq, %1, %104 : vector<8x128xi32>
    %106 = arith.extui %105 : vector<8x128xi1> to vector<8x128xi32>
    %107 = arith.sitofp %106 : vector<8x128xi32> to vector<8x128xf32>
    %cst_52 = arith.constant dense<0.000000e+00> : vector<32x128xf32>
    %108 = tpu.matmul %0, %103, %cst_52 {dimension_numbers = #tpu.dot_dimension_numbers<[1], [0], [0], [1], [0, 0, 1, 1], [], []>, precision = #tpu.contract_precision<fp32>} : vector<32x8xf32>, vector<8x128xf32>, vector<32x128xf32> -> vector<32x128xf32>
    %cst_53 = arith.constant dense<0.000000e+00> : vector<32x128xf32>
    %109 = tpu.matmul %0, %107, %cst_53 {dimension_numbers = #tpu.dot_dimension_numbers<[1], [0], [0], [1], [0, 0, 1, 1], [], []>, precision = #tpu.contract_precision<fp32>} : vector<32x8xf32>, vector<8x128xf32>, vector<32x128xf32> -> vector<32x128xf32>
    %110 = arith.mulf %108, %109 : vector<32x128xf32>
    %cst_54 = arith.constant dense<0.000000e+00> : vector<128xf32>
    %111 = vector.multi_reduction <add>, %110, %cst_54 [0] : vector<32x128xf32> to vector<128xf32>
    %112 = vector.shape_cast %111 : vector<128xf32> to vector<1x128xf32>
    %c6_55 = arith.constant 6 : index
    %c0_56 = arith.constant 0 : index
    %113 = vector.load %arg4[%c6_55, %c0_56] : memref<8x128xf32, #tpu.memory_space<vmem>>, vector<1x128xf32>
    tpu.vector_store %arg4[%c6_55, %c0_56], %112 {strides = array<i32>} : memref<8x128xf32, #tpu.memory_space<vmem>>, vector<1x128xf32>,
    %c7 = arith.constant 7 : index
    %c0_57 = arith.constant 0 : index
    %114 = vector.load %arg1[%c7, %c0_57] : memref<8x128xi32, #tpu.memory_space<vmem>>, vector<1x128xi32>
    %c7_58 = arith.constant 7 : index
    %c0_59 = arith.constant 0 : index
    %115 = vector.load %arg2[%c7_58, %c0_59] : memref<8x128xi32, #tpu.memory_space<vmem>>, vector<1x128xi32>
    %116 = vector.broadcast %114 : vector<1x128xi32> to vector<8x128xi32>
    %117 = arith.cmpi eq, %1, %116 : vector<8x128xi32>
    %118 = arith.extui %117 : vector<8x128xi1> to vector<8x128xi32>
    %119 = arith.sitofp %118 : vector<8x128xi32> to vector<8x128xf32>
    %120 = vector.broadcast %115 : vector<1x128xi32> to vector<8x128xi32>
    %121 = arith.cmpi eq, %1, %120 : vector<8x128xi32>
    %122 = arith.extui %121 : vector<8x128xi1> to vector<8x128xi32>
    %123 = arith.sitofp %122 : vector<8x128xi32> to vector<8x128xf32>
    %cst_60 = arith.constant dense<0.000000e+00> : vector<32x128xf32>
    %124 = tpu.matmul %0, %119, %cst_60 {dimension_numbers = #tpu.dot_dimension_numbers<[1], [0], [0], [1], [0, 0, 1, 1], [], []>, precision = #tpu.contract_precision<fp32>} : vector<32x8xf32>, vector<8x128xf32>, vector<32x128xf32> -> vector<32x128xf32>
    %cst_61 = arith.constant dense<0.000000e+00> : vector<32x128xf32>
    %125 = tpu.matmul %0, %123, %cst_61 {dimension_numbers = #tpu.dot_dimension_numbers<[1], [0], [0], [1], [0, 0, 1, 1], [], []>, precision = #tpu.contract_precision<fp32>} : vector<32x8xf32>, vector<8x128xf32>, vector<32x128xf32> -> vector<32x128xf32>
    %126 = arith.mulf %124, %125 : vector<32x128xf32>
    %cst_62 = arith.constant dense<0.000000e+00> : vector<128xf32>
    %127 = vector.multi_reduction <add>, %126, %cst_62 [0] : vector<32x128xf32> to vector<128xf32>
    %128 = vector.shape_cast %127 : vector<128xf32> to vector<1x128xf32>
    %c7_63 = arith.constant 7 : index
    %c0_64 = arith.constant 0 : index
    %129 = vector.load %arg4[%c7_63, %c0_64] : memref<8x128xf32, #tpu.memory_space<vmem>>, vector<1x128xf32>
    tpu.vector_store %arg4[%c7_63, %c0_64], %128 {strides = array<i32>} : memref<8x128xf32, #tpu.memory_space<vmem>>, vector<1x128xf32>,
    return
  }
  func.func @transform_0(%arg0: i32) -> (i32, i32) {
    %c0_i32 = arith.constant 0 : i32
    %c0_i32_0 = arith.constant 0 : i32
    return %arg0, %c0_i32 : i32, i32
  }
  func.func @transform_1(%arg0: i32) -> (i32, i32) {
    %c0_i32 = arith.constant 0 : i32
    %c0_i32_0 = arith.constant 0 : i32
    return %arg0, %c0_i32 : i32, i32
  }
  func.func @transform_2(%arg0: i32) -> (i32, i32) {
    %c0_i32 = arith.constant 0 : i32
    %c0_i32_0 = arith.constant 0 : i32
    %c0_i32_1 = arith.constant 0 : i32
    return %c0_i32, %c0_i32_0 : i32, i32
  }
  func.func @transform_3(%arg0: i32) -> (i32, i32) {
    %c0_i32 = arith.constant 0 : i32
    %c0_i32_0 = arith.constant 0 : i32
    return %arg0, %c0_i32 : i32, i32
  }
}

</mosaic_0001>

<bundles_post_ra>
// kernel: tpu_custom_call.1
= control target key start
LH: loop header
LB: loop body
LE: loop exit
PB: predicated region body
PF: predicated region fallthrough
CT: control target
= control target key end

     0   :  { %v19_v0 = vlaneseq  ;;  %vm37_vm0 = vcmask 64512   ;;  %v11163_v18 = vmov 1.0   ;;  %v11164_v21 = vmov 0.0   ;;  %s12188_s0 = inlined_call_operand.vmem [shape: s32[8,128], index: 0, kind: input, shape index: {}]   ;;  %s12189_s1 = inlined_call_operand.vmem [shape: s32[8,128], index: 1, kind: input, shape index: {}]   ;;  %s12190_s2 = inlined_call_operand.vmem [shape: f32[32,8], index: 2, kind: input, shape index: {}]   ;;  %s12191_s3 = inlined_call_operand.hbm [shape: f32[8,128], index: 3, kind: output, shape index: {}]  }
   0x1   :  { %v9488_v1 = vld [vmem:[%s12188_s0] ss:$0 sm:$0xff]  ;;  %v16_v4 = vld [vmem:[%s12190_s2 + $0x8] sm:$0xff]  ;;  %v17_v5 = vld [vmem:[%s12190_s2 + $0x10] sm:$0xff] }
   0x2   :  { %v9490_v2 = vld [vmem:[%s12189_s1] ss:$0 sm:$0xff]  ;;  %v18_v6 = vld [vmem:[%s12190_s2 + $0x18] sm:$0xff]  ;;  %v11204_v7 = vshrl.u32 %v19_v0, 7  ;;  %v42_v9 = vsel %vm37_vm0, %v16_v4, 0  ;;  %v45_v10 = vsel %vm37_vm0, %v17_v5, 0 }
   0x3   :  { %v15_v3 = vld [vmem:[%s12190_s2] sm:$0xff]  ;;  %v11208_v12 = vand.u32 4294901760, %v42_v9  ;;  %v11210_v13 = vand.u32 4294901760, %v45_v10  ;;  %v48_v14 = vsel %vm37_vm0, %v18_v6, 0 }
   0x4   :  { %v39_v8 = vsel %vm37_vm0, %v15_v3, 0  ;;  %vm11213_vm1 = vcmp.eq.s32.totalorder %v11204_v7, %v9488_v1  ;;  %vm11218_vm2 = vcmp.eq.s32.totalorder %v11204_v7, %v9490_v2  ;;  %v11222_v17 = vand.u32 4294901760, %v48_v14 }
   0x5   :  { %v11206_v11 = vand.u32 4294901760, %v39_v8  ;;  %10048 = vmatprep.subr.msk.mxu0 %vm11213_vm1, %v11163_v18  ;;  %10096 = vmatprep.subr.msk.mxu1 %vm11218_vm2, %v11163_v18  ;;  %v11234_v20 = vsub.f32 %v42_v9, %v11208_v12  ;;  %v9489_v22 = vsel %vm11213_vm1, 1.0, %v11164_v21  ;;  %v9491_v23 = vsel %vm11218_vm2, 1.0, %v11164_v21 }
   0x7   :  { %v11231_v19 = vsub.f32 %v39_v8, %v11206_v11 }
   0x8   :  { %8 = vsyncpa [#allocation3], 0  ;;  %10049 = vmatpush3.msk.msra.mxu0 %vm11213_vm1, %v11163_v18  ;;  %10097 = vmatpush3.msk.msra.mxu1 %vm11218_vm2, %v11163_v18  ;;  %v158_v24 = vsub.f32 %v9489_v22, %v9489_v22  ;;  %v733_v25 = vsub.f32 %v9491_v23, %v9491_v23  ;;  %v11249_v26 = vsub.f32 %v45_v10, %v11210_v13  ;;  %v11255_v28 = vand.u32 4294901760, %v11234_v20  ;;  %v9498_v46 = vld [vmem:[%s12188_s0 + $0x1] ss:$0 sm:$0xff] }
   0x9   :  { %v11252_v27 = vand.u32 4294901760, %v11231_v19  ;;  %v11258_v29 = vsub.f32 %v48_v14, %v11222_v17  ;;  %v9500_v47 = vld [vmem:[%s12189_s1 + $0x1] ss:$0 sm:$0xff]  ;;  %vm11335_vm3 = vcmp.eq.s32.totalorder %v11204_v7, %v9498_v46  ;;  %v9508_v60 = vld [vmem:[%s12188_s0 + $0x2] ss:$0 sm:$0xff] }
   0xa   :  { %v11260_v30 = vand.u32 4294901760, %v158_v24  ;;  %v11262_v31 = vand.u32 4294901760, %v733_v25  ;;  %v11265_v32 = vand.u32 4294901760, %v11249_v26  ;;  %v129_v34 = vsub.f32 %v11234_v20, %v11255_v28  ;;  %v9510_v61 = vld [vmem:[%s12189_s1 + $0x2] ss:$0 sm:$0xff] }
   0xb   :  { %v119_v33 = vsub.f32 %v11231_v19, %v11252_v27  ;;  %v11272_v35 = vand.u32 4294901760, %v11258_v29  ;;  %vm11340_vm4 = vcmp.eq.s32.totalorder %v11204_v7, %v9500_v47  ;;  %v9499_v50 = vsel %vm11335_vm3, 1.0, %v11164_v21  ;;  %v9518_v14 = vld [vmem:[%s12188_s0 + $0x3] ss:$0 sm:$0xff] }
   0xc   :  { %v160_v36 = vsub.f32 %v158_v24, %v11260_v30  ;;  %v735_v37 = vsub.f32 %v733_v25, %v11262_v31  ;;  %v139_v38 = vsub.f32 %v11249_v26, %v11265_v32  ;;  %v11280_v40 = vand.u32 4294901760, %v129_v34  ;;  %v9520_v15 = vld [vmem:[%s12189_s1 + $0x3] ss:$0 sm:$0xff] }
   0xd   :  { %v11278_v39 = vand.u32 4294901760, %v119_v33  ;;  %v149_v41 = vsub.f32 %v11258_v29, %v11272_v35  ;;  %v9501_v51 = vsel %vm11340_vm4, 1.0, %v11164_v21  ;;  %v1338_v52 = vsub.f32 %v9499_v50, %v9499_v50 }
   0xe   :  { %v161_v42 = vand.u32 4294901760, %v160_v36  ;;  %v736_v43 = vand.u32 4294901760, %v735_v37  ;;  %v11286_v44 = vand.u32 4294901760, %v139_v38  ;;  %v1913_v53 = vsub.f32 %v9501_v51, %v9501_v51 }
   0xf   :  { %10050 = vmatprep.mubr.f32.mxu0 %v11278_v39  ;;  %10098 = vmatprep.mubr.f32.mxu1 %v11278_v39  ;;  %v11290_v45 = vand.u32 4294901760, %v149_v41  ;;  %v11366_v54 = vand.u32 4294901760, %v1338_v52  ;;  %vm11451_vm5 = vcmp.eq.s32.totalorder %v11204_v7, %v9508_v60  ;;  %vm11456_vm6 = vcmp.eq.s32.totalorder %v11204_v7, %v9510_v61  ;;  %v9528_v41 = vld [vmem:[%s12188_s0 + $0x4] ss:$0 sm:$0xff] }
  0x10   :  { %10051 = vmatmul.mubr.f32.vlgmr.msra.gmra.mrb[0].mxu0 %v11280_v40  ;;  %10099 = vmatmul.mubr.f32.vlgmr.msra.gmra.mrb[0].mxu1 %v11280_v40  ;;  %v11368_v55 = vand.u32 4294901760, %v1913_v53  ;;  %v9509_v0 = vsel %vm11451_vm5, 1.0, %v11164_v21  ;;  %v9511_v1 = vsel %vm11456_vm6, 1.0, %v11164_v21  ;;  %vm11567_vm7 = vcmp.eq.s32.totalorder %v11204_v7, %v9518_v14 }
  0x11   :  { %10056 = vmatprep.subr.mxu0 %v161_v42  ;;  %10104 = vmatprep.subr.mxu1 %v736_v43  ;;  %v1340_v56 = vsub.f32 %v1338_v52, %v11366_v54  ;;  %v2518_v2 = vsub.f32 %v9509_v0, %v9509_v0  ;;  %v3093_v3 = vsub.f32 %v9511_v1, %v9511_v1  ;;  %v9519_v23 = vsel %vm11567_vm7, 1.0, %v11164_v21 }
  0x12   :  { %10057 = vmatpush3.msra.mxu0 %v161_v42  ;;  %10105 = vmatpush3.msra.mxu1 %v736_v43  ;;  %v1915_v57 = vsub.f32 %v1913_v53, %v11368_v55  ;;  %vm11572_vm8 = vcmp.eq.s32.totalorder %v11204_v7, %v9520_v15  ;;  %v9530_v42 = vld [vmem:[%s12189_s1 + $0x4] ss:$0 sm:$0xff]  ;;  %vm11683_vm9 = vcmp.eq.s32.totalorder %v11204_v7, %v9528_v41 }
  0x13   :  { %10053 = vmatprep.mubr.f32.mxu0 %v11286_v44  ;;  %10101 = vmatprep.mubr.f32.mxu1 %v11286_v44  ;;  %v1341_v58 = vand.u32 4294901760, %v1340_v56  ;;  %v11482_v4 = vand.u32 4294901760, %v2518_v2  ;;  %v11484_v5 = vand.u32 4294901760, %v3093_v3  ;;  %vm11688_vm10 = vcmp.eq.s32.totalorder %v11204_v7, %v9530_v42 }
  0x14   :  { %10054 = vmatmul.mubr.f32.gmra.mrb[2].mxu0 %v11290_v45  ;;  %10102 = vmatmul.mubr.f32.gmra.mrb[2].mxu1 %v11290_v45  ;;  %v1916_v59 = vand.u32 4294901760, %v1915_v57  ;;  %v9529_v47 = vsel %vm11683_vm9, 1.0, %v11164_v21  ;;  %v9531_v48 = vsel %vm11688_vm10, 1.0, %v11164_v21  ;;  %v9538_v57 = vld [vmem:[%s12188_s0 + $0x5] ss:$0 sm:$0xff] }
  0x15   :  { %10058 = vmatprep.mubr.f32.mxu0 %v11206_v11  ;;  %10106 = vmatprep.mubr.f32.mxu1 %v11206_v11  ;;  %v2520_v6 = vsub.f32 %v2518_v2, %v11482_v4  ;;  %v3095_v8 = vsub.f32 %v3093_v3, %v11484_v5  ;;  %v4878_v49 = vsub.f32 %v9529_v47, %v9529_v47 }
  0x16   :  { %10064 = vmatprep.subr.mxu0 %v158_v24  ;;  %10112 = vmatprep.subr.mxu1 %v733_v25  ;;  %v5453_v50 = vsub.f32 %v9531_v48, %v9531_v48  ;;  %vm11799_vm11 = vcmp.eq.s32.totalorder %v11204_v7, %v9538_v57 }
  0x17   :  { %v2521_v9 = vand.u32 4294901760, %v2520_v6  ;;  %v3096_v10 = vand.u32 4294901760, %v3095_v8  ;;  %v11714_v51 = vand.u32 4294901760, %v4878_v49  ;;  %v9539_v61 = vsel %vm11799_vm11, 1.0, %v11164_v21 }
  0x18   :  { %10059 = vmatmul.mubr.f32.vlgmr.msra.gmra.mrb[0].mxu0 %v11208_v12  ;;  %10107 = vmatmul.mubr.f32.vlgmr.msra.gmra.mrb[0].mxu1 %v11208_v12  ;;  %v6058_v63 = vsub.f32 %v9539_v61, %v9539_v61 }
  0x19   :  { %10065 = vmatpush3.msra.mxu0 %v158_v24  ;;  %10113 = vmatpush3.msra.mxu1 %v733_v25  ;;  %v9521_v24 = vsel %vm11572_vm8, 1.0, %v11164_v21  ;;  %v3698_v25 = vsub.f32 %v9519_v23, %v9519_v23 }
  0x1a   :  { %10061 = vmatprep.mubr.f32.mxu0 %v11210_v13  ;;  %10109 = vmatprep.mubr.f32.mxu1 %v11210_v13  ;;  %v11830_v1 = vand.u32 4294901760, %v6058_v63 }
  0x1b   :  { %10072 = vmatprep.subr.msk.mxu0 %vm11213_vm1, %v11163_v18  ;;  %10120 = vmatprep.subr.msk.mxu1 %vm11218_vm2, %v11163_v18 }
  0x1c   :  { %10062 = vmatmul.mubr.f32.gmra.mrb[2].mxu0 %v11222_v17  ;;  %10110 = vmatmul.mubr.f32.gmra.mrb[2].mxu1 %v11222_v17 }
  0x1d   :  { %10066 = vmatprep.mubr.f32.mxu0 %v11231_v19  ;;  %10114 = vmatprep.mubr.f32.mxu1 %v11231_v19 }
  0x20   :  { %10067 = vmatmul.mubr.f32.vlgmr.msra.gmra.mrb[0].mxu0 %v11234_v20  ;;  %10115 = vmatmul.mubr.f32.vlgmr.msra.gmra.mrb[0].mxu1 %v11234_v20 }
  0x21   :  { %10073 = vmatpush3.msk.msra.mxu0 %vm11213_vm1, %v11163_v18  ;;  %10121 = vmatpush3.msk.msra.mxu1 %vm11218_vm2, %v11163_v18 }
  0x22   :  { %10069 = vmatprep.mubr.f32.mxu0 %v11249_v26  ;;  %10117 = vmatprep.mubr.f32.mxu1 %v11249_v26 }
  0x23   :  { %10080 = vmatprep.subr.mxu0 %v11260_v30  ;;  %10128 = vmatprep.subr.mxu1 %v11262_v31 }
  0x24   :  { %10070 = vmatmul.mubr.f32.gmra.mrb[2].mxu0 %v11258_v29  ;;  %10118 = vmatmul.mubr.f32.gmra.mrb[2].mxu1 %v11258_v29 }
  0x25   :  { %10074 = vmatprep.mubr.f32.mxu0 %v11252_v27  ;;  %10122 = vmatprep.mubr.f32.mxu1 %v11252_v27 }
  0x28   :  { %10075 = vmatmul.mubr.f32.vlgmr.msra.gmra.mrb[0].mxu0 %v11255_v28  ;;  %10123 = vmatmul.mubr.f32.vlgmr.msra.gmra.mrb[0].mxu1 %v11255_v28 }
  0x29   :  { %10081 = vmatpush3.msra.mxu0 %v11260_v30  ;;  %10129 = vmatpush3.msra.mxu1 %v11262_v31  ;;  %v4273_v30 = vsub.f32 %v9521_v24, %v9521_v24  ;;  %v11598_v31 = vand.u32 4294901760, %v3698_v25 }
  0x2a   :  { %10077 = vmatprep.mubr.f32.mxu0 %v11265_v32  ;;  %10125 = vmatprep.mubr.f32.mxu1 %v11265_v32 }
  0x2b   :  { %10088 = vmatprep.subr.msk.mxu0 %vm11213_vm1, %v11163_v18  ;;  %10136 = vmatprep.subr.msk.mxu1 %vm11218_vm2, %v11163_v18  ;;  %v11600_v33 = vand.u32 4294901760, %v4273_v30  ;;  %v3700_v34 = vsub.f32 %v3698_v25, %v11598_v31 }
  0x2c   :  { %10078 = vmatmul.mubr.f32.gmra.mrb[2].mxu0 %v11272_v35  ;;  %10126 = vmatmul.mubr.f32.gmra.mrb[2].mxu1 %v11272_v35 }
  0x2d   :  { %10082 = vmatprep.mubr.f32.mxu0 %v11206_v11  ;;  %10130 = vmatprep.mubr.f32.mxu1 %v11206_v11  ;;  %v4275_v36 = vsub.f32 %v4273_v30, %v11600_v33  ;;  %v3701_v37 = vand.u32 4294901760, %v3700_v34  ;;  %v9548_v34 = vld [vmem:[%s12188_s0 + $0x6] ss:$0 sm:$0xff] }
  0x2e   :  { %vm11915_vm13 = vcmp.eq.s32.totalorder %v11204_v7, %v9548_v34 }
  0x2f   :  { %v4276_v38 = vand.u32 4294901760, %v4275_v36  ;;  %v9550_v36 = vld [vmem:[%s12189_s1 + $0x6] ss:$0 sm:$0xff]  ;;  %v9549_v46 = vsel %vm11915_vm13, 1.0, %v11164_v21 }
  0x30   :  { %10083 = vmatmul.mubr.f32.vlgmr.msra.gmra.mrb[0].mxu0 %v11208_v12  ;;  %10131 = vmatmul.mubr.f32.vlgmr.msra.gmra.mrb[0].mxu1 %v11208_v12  ;;  %vm11920_vm14 = vcmp.eq.s32.totalorder %v11204_v7, %v9550_v36 }
  0x31   :  { %10089 = vmatpush3.msk.msra.mxu0 %vm11213_vm1, %v11163_v18  ;;  %10137 = vmatpush3.msk.msra.mxu1 %vm11218_vm2, %v11163_v18  ;;  %v9551_v47 = vsel %vm11920_vm14, 1.0, %v11164_v21 }
  0x32   :  { %10085 = vmatprep.mubr.f32.mxu0 %v11210_v13  ;;  %10133 = vmatprep.mubr.f32.mxu1 %v11210_v13 }
  0x33   :  { %10144 = vmatprep.subr.msk.mxu0 %vm11335_vm3, %v11163_v18  ;;  %10192 = vmatprep.subr.msk.mxu1 %vm11340_vm4, %v11163_v18 }
  0x34   :  { %10086 = vmatmul.mubr.f32.gmra.mrb[2].mxu0 %v11222_v17  ;;  %10134 = vmatmul.mubr.f32.gmra.mrb[2].mxu1 %v11222_v17 }
  0x35   :  { %10090 = vmatprep.mubr.f32.mxu0 %v11206_v11  ;;  %10138 = vmatprep.mubr.f32.mxu1 %v11206_v11 }
  0x38   :  { %10091 = vmatmul.mubr.f32.vlgmr.msra.gmra.mrb[0].mxu0 %v11208_v12  ;;  %10139 = vmatmul.mubr.f32.vlgmr.msra.gmra.mrb[0].mxu1 %v11208_v12 }
  0x39   :  { %10145 = vmatpush3.msk.msra.mxu0 %vm11335_vm3, %v11163_v18  ;;  %10193 = vmatpush3.msk.msra.mxu1 %vm11340_vm4, %v11163_v18 }
  0x3a   :  { %10093 = vmatprep.mubr.f32.mxu0 %v11210_v13  ;;  %10141 = vmatprep.mubr.f32.mxu1 %v11210_v13 }
  0x3b   :  { %10152 = vmatprep.subr.mxu0 %v1341_v58  ;;  %10200 = vmatprep.subr.mxu1 %v1916_v59 }
  0x3c   :  { %10094 = vmatmul.mubr.f32.gmra.mrb[2].mxu0 %v11222_v17  ;;  %10142 = vmatmul.mubr.f32.gmra.mrb[2].mxu1 %v11222_v17 }
  0x3d   :  { %10146 = vmatprep.mubr.f32.mxu0 %v11278_v39  ;;  %10194 = vmatprep.mubr.f32.mxu1 %v11278_v39 }
  0x40   :  { %10147 = vmatmul.mubr.f32.vlgmr.msra.gmra.mrb[4].mxu0 %v11280_v40  ;;  %10195 = vmatmul.mubr.f32.vlgmr.msra.gmra.mrb[4].mxu1 %v11280_v40 }
  0x41   :  { %10153 = vmatpush3.msra.mxu0 %v1341_v58  ;;  %10201 = vmatpush3.msra.mxu1 %v1916_v59  ;;  %v9540_v58 = vld [vmem:[%s12189_s1 + $0x5] ss:$0 sm:$0xff] }
  0x42   :  { %10149 = vmatprep.mubr.f32.mxu0 %v11286_v44  ;;  %10197 = vmatprep.mubr.f32.mxu1 %v11286_v44  ;;  %vm11804_vm12 = vcmp.eq.s32.totalorder %v11204_v7, %v9540_v58 }
  0x43   :  { %10160 = vmatprep.subr.mxu0 %v1338_v52  ;;  %10208 = vmatprep.subr.mxu1 %v1913_v53  ;;  %v9541_v62 = vsel %vm11804_vm12, 1.0, %v11164_v21 }
  0x44   :  { %10150 = vmatmul.mubr.f32.gmra.mrb[6].mxu0 %v11290_v45  ;;  %10198 = vmatmul.mubr.f32.gmra.mrb[6].mxu1 %v11290_v45  ;;  %v6633_v0 = vsub.f32 %v9541_v62, %v9541_v62 }
  0x45   :  { %10154 = vmatprep.mubr.f32.mxu0 %v11206_v11  ;;  %10202 = vmatprep.mubr.f32.mxu1 %v11206_v11 }
  0x48   :  { %10155 = vmatmul.mubr.f32.vlgmr.msra.gmra.mrb[4].mxu0 %v11208_v12  ;;  %10203 = vmatmul.mubr.f32.vlgmr.msra.gmra.mrb[4].mxu1 %v11208_v12 }
  0x49   :  { %10161 = vmatpush3.msra.mxu0 %v1338_v52  ;;  %10209 = vmatpush3.msra.mxu1 %v1913_v53  ;;  %v11716_v52 = vand.u32 4294901760, %v5453_v50  ;;  %v4880_v53 = vsub.f32 %v4878_v49, %v11714_v51 }
  0x4a   :  { %10157 = vmatprep.mubr.f32.mxu0 %v11210_v13  ;;  %10205 = vmatprep.mubr.f32.mxu1 %v11210_v13 }
  0x4b   :  { %10168 = vmatprep.subr.msk.mxu0 %vm11335_vm3, %v11163_v18  ;;  %10216 = vmatprep.subr.msk.mxu1 %vm11340_vm4, %v11163_v18 }
  0x4c   :  { %10158 = vmatmul.mubr.f32.gmra.mrb[6].mxu0 %v11222_v17  ;;  %10206 = vmatmul.mubr.f32.gmra.mrb[6].mxu1 %v11222_v17 }
  0x4d   :  { %10162 = vmatprep.mubr.f32.mxu0 %v11231_v19  ;;  %10210 = vmatprep.mubr.f32.mxu1 %v11231_v19 }
  0x50   :  { %10163 = vmatmul.mubr.f32.vlgmr.msra.gmra.mrb[4].mxu0 %v11234_v20  ;;  %10211 = vmatmul.mubr.f32.vlgmr.msra.gmra.mrb[4].mxu1 %v11234_v20 }
  0x51   :  { %10169 = vmatpush3.msk.msra.mxu0 %vm11335_vm3, %v11163_v18  ;;  %10217 = vmatpush3.msk.msra.mxu1 %vm11340_vm4, %v11163_v18 }
  0x52   :  { %10165 = vmatprep.mubr.f32.mxu0 %v11249_v26  ;;  %10213 = vmatprep.mubr.f32.mxu1 %v11249_v26 }
  0x53   :  { %10176 = vmatprep.subr.mxu0 %v11366_v54  ;;  %10224 = vmatprep.subr.mxu1 %v11368_v55 }
  0x54   :  { %10166 = vmatmul.mubr.f32.gmra.mrb[6].mxu0 %v11258_v29  ;;  %10214 = vmatmul.mubr.f32.gmra.mrb[6].mxu1 %v11258_v29 }
  0x55   :  { %10170 = vmatprep.mubr.f32.mxu0 %v11252_v27  ;;  %10218 = vmatprep.mubr.f32.mxu1 %v11252_v27 }
  0x58   :  { %10171 = vmatmul.mubr.f32.vlgmr.msra.gmra.mrb[4].mxu0 %v11255_v28  ;;  %10219 = vmatmul.mubr.f32.vlgmr.msra.gmra.mrb[4].mxu1 %v11255_v28 }
  0x59   :  { %10177 = vmatpush3.msra.mxu0 %v11366_v54  ;;  %10225 = vmatpush3.msra.mxu1 %v11368_v55  ;;  %v5455_v54 = vsub.f32 %v5453_v50, %v11716_v52  ;;  %v4881_v55 = vand.u32 4294901760, %v4880_v53 }
  0x5a   :  { %10173 = vmatprep.mubr.f32.mxu0 %v11265_v32  ;;  %10221 = vmatprep.mubr.f32.mxu1 %v11265_v32 }
  0x5b   :  { %10184 = vmatprep.subr.msk.mxu0 %vm11335_vm3, %v11163_v18  ;;  %10232 = vmatprep.subr.msk.mxu1 %vm11340_vm4, %v11163_v18  ;;  %v5456_v56 = vand.u32 4294901760, %v5455_v54 }
  0x5c   :  { %10174 = vmatmul.mubr.f32.gmra.mrb[6].mxu0 %v11272_v35  ;;  %10222 = vmatmul.mubr.f32.gmra.mrb[6].mxu1 %v11272_v35 }
  0x5d   :  { %10178 = vmatprep.mubr.f32.mxu0 %v11206_v11  ;;  %10226 = vmatprep.mubr.f32.mxu1 %v11206_v11 }
  0x60   :  { %10179 = vmatmul.mubr.f32.vlgmr.msra.gmra.mrb[4].mxu0 %v11208_v12  ;;  %10227 = vmatmul.mubr.f32.vlgmr.msra.gmra.mrb[4].mxu1 %v11208_v12 }
  0x61   :  { %10185 = vmatpush3.msk.msra.mxu0 %vm11335_vm3, %v11163_v18  ;;  %10233 = vmatpush3.msk.msra.mxu1 %vm11340_vm4, %v11163_v18 }
  0x62   :  { %10181 = vmatprep.mubr.f32.mxu0 %v11210_v13  ;;  %10229 = vmatprep.mubr.f32.mxu1 %v11210_v13 }
  0x63   :  { %10240 = vmatprep.subr.msk.mxu0 %vm11451_vm5, %v11163_v18  ;;  %10288 = vmatprep.subr.msk.mxu1 %vm11456_vm6, %v11163_v18 }
  0x64   :  { %10182 = vmatmul.mubr.f32.gmra.mrb[6].mxu0 %v11222_v17  ;;  %10230 = vmatmul.mubr.f32.gmra.mrb[6].mxu1 %v11222_v17 }
  0x65   :  { %10186 = vmatprep.mubr.f32.mxu0 %v11206_v11  ;;  %10234 = vmatprep.mubr.f32.mxu1 %v11206_v11 }
  0x68   :  { %10187 = vmatmul.mubr.f32.vlgmr.msra.gmra.mrb[4].mxu0 %v11208_v12  ;;  %10235 = vmatmul.mubr.f32.vlgmr.msra.gmra.mrb[4].mxu1 %v11208_v12 }
  0x69   :  { %10241 = vmatpush3.msk.msra.mxu0 %vm11451_vm5, %v11163_v18  ;;  %10289 = vmatpush3.msk.msra.mxu1 %vm11456_vm6, %v11163_v18 }
  0x6a   :  { %10189 = vmatprep.mubr.f32.mxu0 %v11210_v13  ;;  %10237 = vmatprep.mubr.f32.mxu1 %v11210_v13 }
  0x6b   :  { %10248 = vmatprep.subr.mxu0 %v2521_v9  ;;  %10296 = vmatprep.subr.mxu1 %v3096_v10 }
  0x6c   :  { %10190 = vmatmul.mubr.f32.gmra.mrb[6].mxu0 %v11222_v17  ;;  %10238 = vmatmul.mubr.f32.gmra.mrb[6].mxu1 %v11222_v17 }
  0x6d   :  { %10242 = vmatprep.mubr.f32.mxu0 %v11278_v39  ;;  %10290 = vmatprep.mubr.f32.mxu1 %v11278_v39 }
  0x70   :  { %10243 = vmatmul.mubr.f32.vlgmr.msra.gmra.mrb[8].mxu0 %v11280_v40  ;;  %10291 = vmatmul.mubr.f32.vlgmr.msra.gmra.mrb[8].mxu1 %v11280_v40 }
  0x71   :  { %10249 = vmatpush3.msra.mxu0 %v2521_v9  ;;  %10297 = vmatpush3.msra.mxu1 %v3096_v10 }
  0x72   :  { %10245 = vmatprep.mubr.f32.mxu0 %v11286_v44  ;;  %10293 = vmatprep.mubr.f32.mxu1 %v11286_v44 }
  0x73   :  { %10256 = vmatprep.subr.mxu0 %v2518_v2  ;;  %10304 = vmatprep.subr.mxu1 %v3093_v3 }
  0x74   :  { %10246 = vmatmul.mubr.f32.gmra.mrb[10].mxu0 %v11290_v45  ;;  %10294 = vmatmul.mubr.f32.gmra.mrb[10].mxu1 %v11290_v45 }
  0x75   :  { %10250 = vmatprep.mubr.f32.mxu0 %v11206_v11  ;;  %10298 = vmatprep.mubr.f32.mxu1 %v11206_v11 }
  0x78   :  { %10251 = vmatmul.mubr.f32.vlgmr.msra.gmra.mrb[8].mxu0 %v11208_v12  ;;  %10299 = vmatmul.mubr.f32.vlgmr.msra.gmra.mrb[8].mxu1 %v11208_v12 }
  0x79   :  { %10257 = vmatpush3.msra.mxu0 %v2518_v2  ;;  %10305 = vmatpush3.msra.mxu1 %v3093_v3  ;;  %v11832_v2 = vand.u32 4294901760, %v6633_v0  ;;  %v6060_v3 = vsub.f32 %v6058_v63, %v11830_v1 }
  0x7a   :  { %10253 = vmatprep.mubr.f32.mxu0 %v11210_v13  ;;  %10301 = vmatprep.mubr.f32.mxu1 %v11210_v13 }
  0x7b   :  { %10264 = vmatprep.subr.msk.mxu0 %vm11451_vm5, %v11163_v18  ;;  %10312 = vmatprep.subr.msk.mxu1 %vm11456_vm6, %v11163_v18 }
  0x7c   :  { %10254 = vmatmul.mubr.f32.gmra.mrb[10].mxu0 %v11222_v17  ;;  %10302 = vmatmul.mubr.f32.gmra.mrb[10].mxu1 %v11222_v17 }
  0x7d   :  { %10258 = vmatprep.mubr.f32.mxu0 %v11231_v19  ;;  %10306 = vmatprep.mubr.f32.mxu1 %v11231_v19 }
  0x80   :  { %10259 = vmatmul.mubr.f32.vlgmr.msra.gmra.mrb[8].mxu0 %v11234_v20  ;;  %10307 = vmatmul.mubr.f32.vlgmr.msra.gmra.mrb[8].mxu1 %v11234_v20 }
  0x81   :  { %10265 = vmatpush3.msk.msra.mxu0 %vm11451_vm5, %v11163_v18  ;;  %10313 = vmatpush3.msk.msra.mxu1 %vm11456_vm6, %v11163_v18 }
  0x82   :  { %10261 = vmatprep.mubr.f32.mxu0 %v11249_v26  ;;  %10309 = vmatprep.mubr.f32.mxu1 %v11249_v26 }
  0x83   :  { %10272 = vmatprep.subr.mxu0 %v11482_v4  ;;  %10320 = vmatprep.subr.mxu1 %v11484_v5 }
  0x84   :  { %10262 = vmatmul.mubr.f32.gmra.mrb[10].mxu0 %v11258_v29  ;;  %10310 = vmatmul.mubr.f32.gmra.mrb[10].mxu1 %v11258_v29 }
  0x85   :  { %10266 = vmatprep.mubr.f32.mxu0 %v11252_v27  ;;  %10314 = vmatprep.mubr.f32.mxu1 %v11252_v27 }
  0x88   :  { %10267 = vmatmul.mubr.f32.vlgmr.msra.gmra.mrb[8].mxu0 %v11255_v28  ;;  %10315 = vmatmul.mubr.f32.vlgmr.msra.gmra.mrb[8].mxu1 %v11255_v28 }
  0x89   :  { %10273 = vmatpush3.msra.mxu0 %v11482_v4  ;;  %10321 = vmatpush3.msra.mxu1 %v11484_v5  ;;  %v6635_v4 = vsub.f32 %v6633_v0, %v11832_v2  ;;  %v6061_v5 = vand.u32 4294901760, %v6060_v3 }
  0x8a   :  { %10269 = vmatprep.mubr.f32.mxu0 %v11265_v32  ;;  %10317 = vmatprep.mubr.f32.mxu1 %v11265_v32 }
  0x8b   :  { %10280 = vmatprep.subr.msk.mxu0 %vm11451_vm5, %v11163_v18  ;;  %10328 = vmatprep.subr.msk.mxu1 %vm11456_vm6, %v11163_v18  ;;  %v6636_v6 = vand.u32 4294901760, %v6635_v4 }
  0x8c   :  { %10270 = vmatmul.mubr.f32.gmra.mrb[10].mxu0 %v11272_v35  ;;  %10318 = vmatmul.mubr.f32.gmra.mrb[10].mxu1 %v11272_v35 }
  0x8d   :  { %10274 = vmatprep.mubr.f32.mxu0 %v11206_v11  ;;  %10322 = vmatprep.mubr.f32.mxu1 %v11206_v11 }
  0x90   :  { %10275 = vmatmul.mubr.f32.vlgmr.msra.gmra.mrb[8].mxu0 %v11208_v12  ;;  %10323 = vmatmul.mubr.f32.vlgmr.msra.gmra.mrb[8].mxu1 %v11208_v12 }
  0x91   :  { %10281 = vmatpush3.msk.msra.mxu0 %vm11451_vm5, %v11163_v18  ;;  %10329 = vmatpush3.msk.msra.mxu1 %vm11456_vm6, %v11163_v18 }
  0x92   :  { %10277 = vmatprep.mubr.f32.mxu0 %v11210_v13  ;;  %10325 = vmatprep.mubr.f32.mxu1 %v11210_v13 }
  0x93   :  { %10336 = vmatprep.subr.msk.mxu0 %vm11567_vm7, %v11163_v18  ;;  %10384 = vmatprep.subr.msk.mxu1 %vm11572_vm8, %v11163_v18 }
  0x94   :  { %10278 = vmatmul.mubr.f32.gmra.mrb[10].mxu0 %v11222_v17  ;;  %10326 = vmatmul.mubr.f32.gmra.mrb[10].mxu1 %v11222_v17 }
  0x95   :  { %10282 = vmatprep.mubr.f32.mxu0 %v11206_v11  ;;  %10330 = vmatprep.mubr.f32.mxu1 %v11206_v11 }
  0x98   :  { %10283 = vmatmul.mubr.f32.vlgmr.msra.gmra.mrb[8].mxu0 %v11208_v12  ;;  %10331 = vmatmul.mubr.f32.vlgmr.msra.gmra.mrb[8].mxu1 %v11208_v12 }
  0x99   :  { %10337 = vmatpush3.msk.msra.mxu0 %vm11567_vm7, %v11163_v18  ;;  %10385 = vmatpush3.msk.msra.mxu1 %vm11572_vm8, %v11163_v18 }
  0x9a   :  { %10285 = vmatprep.mubr.f32.mxu0 %v11210_v13  ;;  %10333 = vmatprep.mubr.f32.mxu1 %v11210_v13 }
  0x9b   :  { %10344 = vmatprep.subr.mxu0 %v3701_v37  ;;  %10392 = vmatprep.subr.mxu1 %v4276_v38 }
  0x9c   :  { %10286 = vmatmul.mubr.f32.gmra.mrb[10].mxu0 %v11222_v17  ;;  %10334 = vmatmul.mubr.f32.gmra.mrb[10].mxu1 %v11222_v17 }
  0x9d   :  { %10338 = vmatprep.mubr.f32.mxu0 %v11278_v39  ;;  %10386 = vmatprep.mubr.f32.mxu1 %v11278_v39 }
  0xa0   :  { %10339 = vmatmul.mubr.f32.vlgmr.msra.gmra.mrb[12].mxu0 %v11280_v40  ;;  %10387 = vmatmul.mubr.f32.vlgmr.msra.gmra.mrb[12].mxu1 %v11280_v40 }
  0xa1   :  { %10345 = vmatpush3.msra.mxu0 %v3701_v37  ;;  %10393 = vmatpush3.msra.mxu1 %v4276_v38 }
  0xa2   :  { %10341 = vmatprep.mubr.f32.mxu0 %v11286_v44  ;;  %10389 = vmatprep.mubr.f32.mxu1 %v11286_v44 }
  0xa3   :  { %10352 = vmatprep.subr.mxu0 %v3698_v25  ;;  %10400 = vmatprep.subr.mxu1 %v4273_v30 }
  0xa4   :  { %10342 = vmatmul.mubr.f32.gmra.mrb[14].mxu0 %v11290_v45  ;;  %10390 = vmatmul.mubr.f32.gmra.mrb[14].mxu1 %v11290_v45 }
  0xa5   :  { %10346 = vmatprep.mubr.f32.mxu0 %v11206_v11  ;;  %10394 = vmatprep.mubr.f32.mxu1 %v11206_v11 }
  0xa8   :  { %10347 = vmatmul.mubr.f32.vlgmr.msra.gmra.mrb[12].mxu0 %v11208_v12  ;;  %10395 = vmatmul.mubr.f32.vlgmr.msra.gmra.mrb[12].mxu1 %v11208_v12 }
  0xa9   :  { %10353 = vmatpush3.msra.mxu0 %v3698_v25  ;;  %10401 = vmatpush3.msra.mxu1 %v4273_v30 }
  0xaa   :  { %10349 = vmatprep.mubr.f32.mxu0 %v11210_v13  ;;  %10397 = vmatprep.mubr.f32.mxu1 %v11210_v13 }
  0xab   :  { %10360 = vmatprep.subr.msk.mxu0 %vm11567_vm7, %v11163_v18  ;;  %10408 = vmatprep.subr.msk.mxu1 %vm11572_vm8, %v11163_v18 }
  0xac   :  { %10350 = vmatmul.mubr.f32.gmra.mrb[14].mxu0 %v11222_v17  ;;  %10398 = vmatmul.mubr.f32.gmra.mrb[14].mxu1 %v11222_v17 }
  0xad   :  { %10354 = vmatprep.mubr.f32.mxu0 %v11231_v19  ;;  %10402 = vmatprep.mubr.f32.mxu1 %v11231_v19 }
  0xb0   :  { %10355 = vmatmul.mubr.f32.vlgmr.msra.gmra.mrb[12].mxu0 %v11234_v20  ;;  %10403 = vmatmul.mubr.f32.vlgmr.msra.gmra.mrb[12].mxu1 %v11234_v20 }
  0xb1   :  { %10361 = vmatpush3.msk.msra.mxu0 %vm11567_vm7, %v11163_v18  ;;  %10409 = vmatpush3.msk.msra.mxu1 %vm11572_vm8, %v11163_v18 }
  0xb2   :  { %10357 = vmatprep.mubr.f32.mxu0 %v11249_v26  ;;  %10405 = vmatprep.mubr.f32.mxu1 %v11249_v26 }
  0xb3   :  { %10368 = vmatprep.subr.mxu0 %v11598_v31  ;;  %10416 = vmatprep.subr.mxu1 %v11600_v33 }
  0xb4   :  { %10358 = vmatmul.mubr.f32.gmra.mrb[14].mxu0 %v11258_v29  ;;  %10406 = vmatmul.mubr.f32.gmra.mrb[14].mxu1 %v11258_v29 }
  0xb5   :  { %10362 = vmatprep.mubr.f32.mxu0 %v11252_v27  ;;  %10410 = vmatprep.mubr.f32.mxu1 %v11252_v27 }
  0xb8   :  { %10363 = vmatmul.mubr.f32.vlgmr.msra.gmra.mrb[12].mxu0 %v11255_v28  ;;  %10411 = vmatmul.mubr.f32.vlgmr.msra.gmra.mrb[12].mxu1 %v11255_v28 }
  0xb9   :  { %10369 = vmatpush3.msra.mxu0 %v11598_v31  ;;  %10417 = vmatpush3.msra.mxu1 %v11600_v33 }
  0xba   :  { %10365 = vmatprep.mubr.f32.mxu0 %v11265_v32  ;;  %10413 = vmatprep.mubr.f32.mxu1 %v11265_v32 }
  0xbb   :  { %10376 = vmatprep.subr.msk.mxu0 %vm11567_vm7, %v11163_v18  ;;  %10424 = vmatprep.subr.msk.mxu1 %vm11572_vm8, %v11163_v18 }
  0xbc   :  { %10366 = vmatmul.mubr.f32.gmra.mrb[14].mxu0 %v11272_v35  ;;  %10414 = vmatmul.mubr.f32.gmra.mrb[14].mxu1 %v11272_v35 }
  0xbd   :  { %10370 = vmatprep.mubr.f32.mxu0 %v11206_v11  ;;  %10418 = vmatprep.mubr.f32.mxu1 %v11206_v11 }
  0xc0   :  { %10371 = vmatmul.mubr.f32.vlgmr.msra.gmra.mrb[12].mxu0 %v11208_v12  ;;  %10419 = vmatmul.mubr.f32.vlgmr.msra.gmra.mrb[12].mxu1 %v11208_v12 }
  0xc1   :  { %10377 = vmatpush3.msk.msra.mxu0 %vm11567_vm7, %v11163_v18  ;;  %10425 = vmatpush3.msk.msra.mxu1 %vm11572_vm8, %v11163_v18 }
  0xc2   :  { %10373 = vmatprep.mubr.f32.mxu0 %v11210_v13  ;;  %10421 = vmatprep.mubr.f32.mxu1 %v11210_v13 }
  0xc3   :  { %10432 = vmatprep.subr.msk.mxu0 %vm11683_vm9, %v11163_v18  ;;  %10480 = vmatprep.subr.msk.mxu1 %vm11688_vm10, %v11163_v18 }
  0xc4   :  { %10374 = vmatmul.mubr.f32.gmra.mrb[14].mxu0 %v11222_v17  ;;  %10422 = vmatmul.mubr.f32.gmra.mrb[14].mxu1 %v11222_v17 }
  0xc5   :  { %10378 = vmatprep.mubr.f32.mxu0 %v11206_v11  ;;  %10426 = vmatprep.mubr.f32.mxu1 %v11206_v11 }
  0xc8   :  { %10379 = vmatmul.mubr.f32.vlgmr.msra.gmra.mrb[12].mxu0 %v11208_v12  ;;  %10427 = vmatmul.mubr.f32.vlgmr.msra.gmra.mrb[12].mxu1 %v11208_v12 }
  0xc9   :  { %10433 = vmatpush3.msk.msra.mxu0 %vm11683_vm9, %v11163_v18  ;;  %10481 = vmatpush3.msk.msra.mxu1 %vm11688_vm10, %v11163_v18 }
  0xca   :  { %10381 = vmatprep.mubr.f32.mxu0 %v11210_v13  ;;  %10429 = vmatprep.mubr.f32.mxu1 %v11210_v13 }
  0xcb   :  { %10440 = vmatprep.subr.mxu0 %v4881_v55  ;;  %10488 = vmatprep.subr.mxu1 %v5456_v56 }
  0xcc   :  { %10382 = vmatmul.mubr.f32.gmra.mrb[14].mxu0 %v11222_v17  ;;  %10430 = vmatmul.mubr.f32.gmra.mrb[14].mxu1 %v11222_v17 }
  0xcd   :  { %10434 = vmatprep.mubr.f32.mxu0 %v11278_v39  ;;  %10482 = vmatprep.mubr.f32.mxu1 %v11278_v39 }
  0xd0   :  { %10435 = vmatmul.mubr.f32.vlgmr.msra.gmra.mrb[16].mxu0 %v11280_v40  ;;  %10483 = vmatmul.mubr.f32.vlgmr.msra.gmra.mrb[16].mxu1 %v11280_v40 }
  0xd1   :  { %10441 = vmatpush3.msra.mxu0 %v4881_v55  ;;  %10489 = vmatpush3.msra.mxu1 %v5456_v56 }
  0xd2   :  { %10437 = vmatprep.mubr.f32.mxu0 %v11286_v44  ;;  %10485 = vmatprep.mubr.f32.mxu1 %v11286_v44 }
  0xd3   :  { %10448 = vmatprep.subr.mxu0 %v4878_v49  ;;  %10496 = vmatprep.subr.mxu1 %v5453_v50 }
  0xd4   :  { %10438 = vmatmul.mubr.f32.gmra.mrb[18].mxu0 %v11290_v45  ;;  %10486 = vmatmul.mubr.f32.gmra.mrb[18].mxu1 %v11290_v45 }
  0xd5   :  { %10442 = vmatprep.mubr.f32.mxu0 %v11206_v11  ;;  %10490 = vmatprep.mubr.f32.mxu1 %v11206_v11 }
  0xd8   :  { %10443 = vmatmul.mubr.f32.vlgmr.msra.gmra.mrb[16].mxu0 %v11208_v12  ;;  %10491 = vmatmul.mubr.f32.vlgmr.msra.gmra.mrb[16].mxu1 %v11208_v12 }
  0xd9   :  { %10449 = vmatpush3.msra.mxu0 %v4878_v49  ;;  %10497 = vmatpush3.msra.mxu1 %v5453_v50  ;;  %v7238_v50 = vsub.f32 %v9549_v46, %v9549_v46 }
  0xda   :  { %10445 = vmatprep.mubr.f32.mxu0 %v11210_v13  ;;  %10493 = vmatprep.mubr.f32.mxu1 %v11210_v13 }
  0xdb   :  { %10456 = vmatprep.subr.msk.mxu0 %vm11683_vm9, %v11163_v18  ;;  %10504 = vmatprep.subr.msk.mxu1 %vm11688_vm10, %v11163_v18  ;;  %v11946_v54 = vand.u32 4294901760, %v7238_v50 }
  0xdc   :  { %10446 = vmatmul.mubr.f32.gmra.mrb[18].mxu0 %v11222_v17  ;;  %10494 = vmatmul.mubr.f32.gmra.mrb[18].mxu1 %v11222_v17 }
  0xdd   :  { %10450 = vmatprep.mubr.f32.mxu0 %v11231_v19  ;;  %10498 = vmatprep.mubr.f32.mxu1 %v11231_v19  ;;  %v7240_v57 = vsub.f32 %v7238_v50, %v11946_v54 }
  0xdf   :  { %v7241_v59 = vand.u32 4294901760, %v7240_v57 }
  0xe0   :  { %10451 = vmatmul.mubr.f32.vlgmr.msra.gmra.mrb[16].mxu0 %v11234_v20  ;;  %10499 = vmatmul.mubr.f32.vlgmr.msra.gmra.mrb[16].mxu1 %v11234_v20 }
  0xe1   :  { %10457 = vmatpush3.msk.msra.mxu0 %vm11683_vm9, %v11163_v18  ;;  %10505 = vmatpush3.msk.msra.mxu1 %vm11688_vm10, %v11163_v18 }
  0xe2   :  { %10453 = vmatprep.mubr.f32.mxu0 %v11249_v26  ;;  %10501 = vmatprep.mubr.f32.mxu1 %v11249_v26 }
  0xe3   :  { %10464 = vmatprep.subr.mxu0 %v11714_v51  ;;  %10512 = vmatprep.subr.mxu1 %v11716_v52 }
  0xe4   :  { %10454 = vmatmul.mubr.f32.gmra.mrb[18].mxu0 %v11258_v29  ;;  %10502 = vmatmul.mubr.f32.gmra.mrb[18].mxu1 %v11258_v29 }
  0xe5   :  { %10458 = vmatprep.mubr.f32.mxu0 %v11252_v27  ;;  %10506 = vmatprep.mubr.f32.mxu1 %v11252_v27 }
  0xe8   :  { %10459 = vmatmul.mubr.f32.vlgmr.msra.gmra.mrb[16].mxu0 %v11255_v28  ;;  %10507 = vmatmul.mubr.f32.vlgmr.msra.gmra.mrb[16].mxu1 %v11255_v28 }
  0xe9   :  { %10465 = vmatpush3.msra.mxu0 %v11714_v51  ;;  %10513 = vmatpush3.msra.mxu1 %v11716_v52  ;;  %v7813_v51 = vsub.f32 %v9551_v47, %v9551_v47 }
  0xea   :  { %10461 = vmatprep.mubr.f32.mxu0 %v11265_v32  ;;  %10509 = vmatprep.mubr.f32.mxu1 %v11265_v32 }
  0xeb   :  { %10472 = vmatprep.subr.msk.mxu0 %vm11683_vm9, %v11163_v18  ;;  %10520 = vmatprep.subr.msk.mxu1 %vm11688_vm10, %v11163_v18  ;;  %v11948_v55 = vand.u32 4294901760, %v7813_v51 }
  0xec   :  { %10462 = vmatmul.mubr.f32.gmra.mrb[18].mxu0 %v11272_v35  ;;  %10510 = vmatmul.mubr.f32.gmra.mrb[18].mxu1 %v11272_v35 }
  0xed   :  { %10466 = vmatprep.mubr.f32.mxu0 %v11206_v11  ;;  %10514 = vmatprep.mubr.f32.mxu1 %v11206_v11  ;;  %v7815_v58 = vsub.f32 %v7813_v51, %v11948_v55 }
  0xef   :  { %v7816_v60 = vand.u32 4294901760, %v7815_v58 }
  0xf0   :  { %10467 = vmatmul.mubr.f32.vlgmr.msra.gmra.mrb[16].mxu0 %v11208_v12  ;;  %10515 = vmatmul.mubr.f32.vlgmr.msra.gmra.mrb[16].mxu1 %v11208_v12 }
  0xf1   :  { %10473 = vmatpush3.msk.msra.mxu0 %vm11683_vm9, %v11163_v18  ;;  %10521 = vmatpush3.msk.msra.mxu1 %vm11688_vm10, %v11163_v18 }
  0xf2   :  { %10469 = vmatprep.mubr.f32.mxu0 %v11210_v13  ;;  %10517 = vmatprep.mubr.f32.mxu1 %v11210_v13 }
  0xf3   :  { %10528 = vmatprep.subr.msk.mxu0 %vm11799_vm11, %v11163_v18  ;;  %10576 = vmatprep.subr.msk.mxu1 %vm11804_vm12, %v11163_v18 }
  0xf4   :  { %10470 = vmatmul.mubr.f32.gmra.mrb[18].mxu0 %v11222_v17  ;;  %10518 = vmatmul.mubr.f32.gmra.mrb[18].mxu1 %v11222_v17 }
  0xf5   :  { %10474 = vmatprep.mubr.f32.mxu0 %v11206_v11  ;;  %10522 = vmatprep.mubr.f32.mxu1 %v11206_v11 }
  0xf8   :  { %10475 = vmatmul.mubr.f32.vlgmr.msra.gmra.mrb[16].mxu0 %v11208_v12  ;;  %10523 = vmatmul.mubr.f32.vlgmr.msra.gmra.mrb[16].mxu1 %v11208_v12 }
  0xf9   :  { %10529 = vmatpush3.msk.msra.mxu0 %vm11799_vm11, %v11163_v18  ;;  %10577 = vmatpush3.msk.msra.mxu1 %vm11804_vm12, %v11163_v18 }
  0xfa   :  { %10477 = vmatprep.mubr.f32.mxu0 %v11210_v13  ;;  %10525 = vmatprep.mubr.f32.mxu1 %v11210_v13 }
  0xfb   :  { %10536 = vmatprep.subr.mxu0 %v6061_v5  ;;  %10584 = vmatprep.subr.mxu1 %v6636_v6 }
  0xfc   :  { %10478 = vmatmul.mubr.f32.gmra.mrb[18].mxu0 %v11222_v17  ;;  %10526 = vmatmul.mubr.f32.gmra.mrb[18].mxu1 %v11222_v17 }
  0xfd   :  { %10530 = vmatprep.mubr.f32.mxu0 %v11278_v39  ;;  %10578 = vmatprep.mubr.f32.mxu1 %v11278_v39 }
 0x100   :  { %10531 = vmatmul.mubr.f32.vlgmr.msra.gmra.mrb[20].mxu0 %v11280_v40  ;;  %10579 = vmatmul.mubr.f32.vlgmr.msra.gmra.mrb[20].mxu1 %v11280_v40 }
 0x101   :  { %10537 = vmatpush3.msra.mxu0 %v6061_v5  ;;  %10585 = vmatpush3.msra.mxu1 %v6636_v6 }
 0x102   :  { %10533 = vmatprep.mubr.f32.mxu0 %v11286_v44  ;;  %10581 = vmatprep.mubr.f32.mxu1 %v11286_v44 }
 0x103   :  { %10544 = vmatprep.subr.mxu0 %v6058_v63  ;;  %10592 = vmatprep.subr.mxu1 %v6633_v0 }
 0x104   :  { %10534 = vmatmul.mubr.f32.gmra.mrb[22].mxu0 %v11290_v45  ;;  %10582 = vmatmul.mubr.f32.gmra.mrb[22].mxu1 %v11290_v45 }
 0x105   :  { %10538 = vmatprep.mubr.f32.mxu0 %v11206_v11  ;;  %10586 = vmatprep.mubr.f32.mxu1 %v11206_v11 }
 0x108   :  { %10539 = vmatmul.mubr.f32.vlgmr.msra.gmra.mrb[20].mxu0 %v11208_v12  ;;  %10587 = vmatmul.mubr.f32.vlgmr.msra.gmra.mrb[20].mxu1 %v11208_v12 }
 0x109   :  { %10545 = vmatpush3.msra.mxu0 %v6058_v63  ;;  %10593 = vmatpush3.msra.mxu1 %v6633_v0 }
 0x10a   :  { %10541 = vmatprep.mubr.f32.mxu0 %v11210_v13  ;;  %10589 = vmatprep.mubr.f32.mxu1 %v11210_v13 }
 0x10b   :  { %v10092_v8 = vpop.f32.mrb[0].mxu0  ;;  %v10140_v9 = vpop.f32.mrb[0].mxu1  ;;  %10552 = vmatprep.subr.msk.mxu0 %vm11799_vm11, %v11163_v18  ;;  %10600 = vmatprep.subr.msk.mxu1 %vm11804_vm12, %v11163_v18 }
 0x10c   :  { %v1201_v10 = vmul.f32 %v10140_v9, %v10092_v8  ;;  %v603_v14 = vpop.f32.mrb[1].mxu0  ;;  %v1178_v15 = vpop.f32.mrb[1].mxu1  ;;  %10542 = vmatmul.mubr.f32.gmra.mrb[22].mxu0 %v11222_v17  ;;  %10590 = vmatmul.mubr.f32.gmra.mrb[22].mxu1 %v11222_v17 }
 0x10d   :  { %v1200_v16 = vmul.f32 %v1178_v15, %v603_v14  ;;  %10546 = vmatprep.mubr.f32.mxu0 %v11231_v19  ;;  %10594 = vmatprep.mubr.f32.mxu1 %v11231_v19  ;;  %v9558_v14 = vld [vmem:[%s12188_s0 + $0x7] ss:$0 sm:$0xff]  ;;  %s11165_s0 = smov [#allocation2]  }
 0x10e   :  { %v9560_v15 = vld [vmem:[%s12189_s1 + $0x7] ss:$0 sm:$0xff]  ;;  %vm12031_vm15 = vcmp.eq.s32.totalorder %v11204_v7, %v9558_v14  ;;  %s9480_s1 = sshll.u32 %s11165_s0, 4  ;;  %s9481_s1 = int_to_ptr.vmem [resolvable:$true] %s9480_s1 }
 0x10f   :  { %v1204_v22 = vadd.f32 %v1201_v10, %v1200_v16  ;;  %v10095_v23 = vpop.f32.mrb[2].mxu0  ;;  %v10143_v24 = vpop.f32.mrb[2].mxu1  ;;  %vm12036_vm0 = vcmp.eq.s32.totalorder %v11204_v7, %v9560_v15  ;;  %s11139_s2 = scalar_lea.vmem %s9481_s1, 128  ;;  %p11144_p1 = scmp.lt.s32.totalorder %s9481_s1, %s9481_s1 }
 0x110   :  { %v1203_v25 = vmul.f32 %v10143_v24, %v10095_v23  ;;  %v615_v30 = vpop.f32.mrb[3].mxu0  ;;  %v1190_v31 = vpop.f32.mrb[3].mxu1  ;;  %10547 = vmatmul.mubr.f32.vlgmr.msra.gmra.mrb[20].mxu0 %v11234_v20  ;;  %10595 = vmatmul.mubr.f32.vlgmr.msra.gmra.mrb[20].mxu1 %v11234_v20  ;;  %p11140_p0 = scmp.ne.s32.totalorder %s9481_s1, %s11139_s2  ;;  %p11145_p2 = scmp.lt.s32.totalorder %s11139_s2, %s11139_s2 }
 0x111   :  { %v1202_v33 = vmul.f32 %v1190_v31, %v615_v30  ;;  %10553 = vmatpush3.msk.msra.mxu0 %vm11799_vm11, %v11163_v18  ;;  %10601 = vmatpush3.msk.msra.mxu1 %vm11804_vm12, %v11163_v18  ;;  %v9559_v30 = vsel %vm12031_vm15, 1.0, %v11164_v21  ;;  %v9561_v31 = vsel %vm12036_vm0, 1.0, %v11164_v21 }
 0x112   :  { %10549 = vmatprep.mubr.f32.mxu0 %v11249_v26  ;;  %10597 = vmatprep.mubr.f32.mxu1 %v11249_v26  ;;  %v8418_v34 = vsub.f32 %v9559_v30, %v9559_v30  ;;  %v8993_v21 = vsub.f32 %v9561_v31, %v9561_v31  ;;  %p11146_p3 = por %p11145_p2, %p11144_p1 }
 0x113   :  { %v1205_v37 = vadd.f32 %v1204_v22, %v1202_v33  ;;  %10560 = vmatprep.subr.mxu0 %v11830_v1  ;;  %10608 = vmatprep.subr.mxu1 %v11832_v2 }
 0x114   :  { %10550 = vmatmul.mubr.f32.gmra.mrb[22].mxu0 %v11258_v29  ;;  %10598 = vmatmul.mubr.f32.gmra.mrb[22].mxu1 %v11258_v29  ;;  %p11147_p4 = pnand %p11146_p3, %p11140_p0 }
 0x115   :  { %v1206_v38 = vadd.f32 %v1205_v37, %v1203_v25  ;;  %10554 = vmatprep.mubr.f32.mxu0 %v11252_v27  ;;  %10602 = vmatprep.mubr.f32.mxu1 %v11252_v27 }
 0x117   :  { %v1207_v43 = vrot.slane %v1206_v38, 4 }
 0x118   :  { %10555 = vmatmul.mubr.f32.vlgmr.msra.gmra.mrb[20].mxu0 %v11255_v28  ;;  %10603 = vmatmul.mubr.f32.vlgmr.msra.gmra.mrb[20].mxu1 %v11255_v28 }
 0x119   :  { %v1208_v48 = vadd.f32 %v1207_v43, %v1206_v38  ;;  %10561 = vmatpush3.msra.mxu0 %v11830_v1  ;;  %10609 = vmatpush3.msra.mxu1 %v11832_v2  ;;  %v12062_v38 = vand.u32 4294901760, %v8418_v34  ;;  %v12064_v43 = vand.u32 4294901760, %v8993_v21 }
 0x11a   :  { %10557 = vmatprep.mubr.f32.mxu0 %v11265_v32  ;;  %10605 = vmatprep.mubr.f32.mxu1 %v11265_v32 }
 0x11b   :  { %v1209_v49 = vrot.slane %v1208_v48, 2  ;;  %10568 = vmatprep.subr.msk.mxu0 %vm11799_vm11, %v11163_v18  ;;  %10616 = vmatprep.subr.msk.mxu1 %vm11804_vm12, %v11163_v18  ;;  %v8420_v41 = vsub.f32 %v8418_v34, %v12062_v38  ;;  %v8995_v47 = vsub.f32 %v8993_v21, %v12064_v43 }
 0x11c   :  { %10558 = vmatmul.mubr.f32.gmra.mrb[22].mxu0 %v11272_v35  ;;  %10606 = vmatmul.mubr.f32.gmra.mrb[22].mxu1 %v11272_v35 }
 0x11d   :  { %v1210_v52 = vadd.f32 %v1209_v49, %v1208_v48  ;;  %10562 = vmatprep.mubr.f32.mxu0 %v11206_v11  ;;  %10610 = vmatprep.mubr.f32.mxu1 %v11206_v11  ;;  %v8421_v42 = vand.u32 4294901760, %v8420_v41  ;;  %v8996_v48 = vand.u32 4294901760, %v8995_v47 }
 0x11f   :  { %v1211_v53 = vrot.slane %v1210_v52, 1 }
 0x120   :  { %10563 = vmatmul.mubr.f32.vlgmr.msra.gmra.mrb[20].mxu0 %v11208_v12  ;;  %10611 = vmatmul.mubr.f32.vlgmr.msra.gmra.mrb[20].mxu1 %v11208_v12 }
 0x121   :  { %v1212_v56 = vadd.f32 %v1211_v53, %v1210_v52  ;;  %10569 = vmatpush3.msk.msra.mxu0 %vm11799_vm11, %v11163_v18  ;;  %10617 = vmatpush3.msk.msra.mxu1 %vm11804_vm12, %v11163_v18 }
 0x122   :  { %10565 = vmatprep.mubr.f32.mxu0 %v11210_v13  ;;  %10613 = vmatprep.mubr.f32.mxu1 %v11210_v13 }
 0x123   :  { %1213 = vst [vmem:[#allocation2] sm:$0x1] %v1212_v56  ;;  %10624 = vmatprep.subr.msk.mxu0 %vm11915_vm13, %v11163_v18  ;;  %10672 = vmatprep.subr.msk.mxu1 %vm11920_vm14, %v11163_v18 }
 0x124   :  { %10566 = vmatmul.mubr.f32.gmra.mrb[22].mxu0 %v11222_v17  ;;  %10614 = vmatmul.mubr.f32.gmra.mrb[22].mxu1 %v11222_v17 }
 0x125   :  { %10570 = vmatprep.mubr.f32.mxu0 %v11206_v11  ;;  %10618 = vmatprep.mubr.f32.mxu1 %v11206_v11 }
 0x128   :  { %10571 = vmatmul.mubr.f32.vlgmr.msra.gmra.mrb[20].mxu0 %v11208_v12  ;;  %10619 = vmatmul.mubr.f32.vlgmr.msra.gmra.mrb[20].mxu1 %v11208_v12 }
 0x129   :  { %10625 = vmatpush3.msk.msra.mxu0 %vm11915_vm13, %v11163_v18  ;;  %10673 = vmatpush3.msk.msra.mxu1 %vm11920_vm14, %v11163_v18 }
 0x12a   :  { %10573 = vmatprep.mubr.f32.mxu0 %v11210_v13  ;;  %10621 = vmatprep.mubr.f32.mxu1 %v11210_v13 }
 0x12b   :  { %10632 = vmatprep.subr.mxu0 %v7241_v59  ;;  %10680 = vmatprep.subr.mxu1 %v7816_v60 }
 0x12c   :  { %10574 = vmatmul.mubr.f32.gmra.mrb[22].mxu0 %v11222_v17  ;;  %10622 = vmatmul.mubr.f32.gmra.mrb[22].mxu1 %v11222_v17 }
 0x12d   :  { %10626 = vmatprep.mubr.f32.mxu0 %v11278_v39  ;;  %10674 = vmatprep.mubr.f32.mxu1 %v11278_v39 }
 0x130   :  { %10627 = vmatmul.mubr.f32.vlgmr.msra.gmra.mrb[24].mxu0 %v11280_v40  ;;  %10675 = vmatmul.mubr.f32.vlgmr.msra.gmra.mrb[24].mxu1 %v11280_v40 }
 0x131   :  { %10633 = vmatpush3.msra.mxu0 %v7241_v59  ;;  %10681 = vmatpush3.msra.mxu1 %v7816_v60 }
 0x132   :  { %10629 = vmatprep.mubr.f32.mxu0 %v11286_v44  ;;  %10677 = vmatprep.mubr.f32.mxu1 %v11286_v44 }
 0x133   :  { %10640 = vmatprep.subr.mxu0 %v7238_v50  ;;  %10688 = vmatprep.subr.mxu1 %v7813_v51 }
 0x134   :  { %10630 = vmatmul.mubr.f32.gmra.mrb[26].mxu0 %v11290_v45  ;;  %10678 = vmatmul.mubr.f32.gmra.mrb[26].mxu1 %v11290_v45 }
 0x135   :  { %10634 = vmatprep.mubr.f32.mxu0 %v11206_v11  ;;  %10682 = vmatprep.mubr.f32.mxu1 %v11206_v11 }
 0x138   :  { %10635 = vmatmul.mubr.f32.vlgmr.msra.gmra.mrb[24].mxu0 %v11208_v12  ;;  %10683 = vmatmul.mubr.f32.vlgmr.msra.gmra.mrb[24].mxu1 %v11208_v12 }
 0x139   :  { %10641 = vmatpush3.msra.mxu0 %v7238_v50  ;;  %10689 = vmatpush3.msra.mxu1 %v7813_v51 }
 0x13a   :  { %10637 = vmatprep.mubr.f32.mxu0 %v11210_v13  ;;  %10685 = vmatprep.mubr.f32.mxu1 %v11210_v13 }
 0x13b   :  { %v10188_v61 = vpop.f32.mrb[4].mxu0  ;;  %v10236_v62 = vpop.f32.mrb[4].mxu1  ;;  %10648 = vmatprep.subr.msk.mxu0 %vm11915_vm13, %v11163_v18  ;;  %10696 = vmatprep.subr.msk.mxu1 %vm11920_vm14, %v11163_v18 }
 0x13c   :  { %v2381_v63 = vmul.f32 %v10236_v62, %v10188_v61  ;;  %v1783_v0 = vpop.f32.mrb[5].mxu0  ;;  %v2358_v1 = vpop.f32.mrb[5].mxu1  ;;  %10638 = vmatmul.mubr.f32.gmra.mrb[26].mxu0 %v11222_v17  ;;  %10686 = vmatmul.mubr.f32.gmra.mrb[26].mxu1 %v11222_v17 }
 0x13d   :  { %v2380_v2 = vmul.f32 %v2358_v1, %v1783_v0  ;;  %10642 = vmatprep.mubr.f32.mxu0 %v11231_v19  ;;  %10690 = vmatprep.mubr.f32.mxu1 %v11231_v19 }
 0x13f   :  { %v2384_v3 = vadd.f32 %v2381_v63, %v2380_v2  ;;  %v10191_v4 = vpop.f32.mrb[6].mxu0  ;;  %v10239_v5 = vpop.f32.mrb[6].mxu1 }
 0x140   :  { %v2383_v6 = vmul.f32 %v10239_v5, %v10191_v4  ;;  %v1795_v8 = vpop.f32.mrb[7].mxu0  ;;  %v2370_v9 = vpop.f32.mrb[7].mxu1  ;;  %10643 = vmatmul.mubr.f32.vlgmr.msra.gmra.mrb[24].mxu0 %v11234_v20  ;;  %10691 = vmatmul.mubr.f32.vlgmr.msra.gmra.mrb[24].mxu1 %v11234_v20 }
 0x141   :  { %v2382_v10 = vmul.f32 %v2370_v9, %v1795_v8  ;;  %10649 = vmatpush3.msk.msra.mxu0 %vm11915_vm13, %v11163_v18  ;;  %10697 = vmatpush3.msk.msra.mxu1 %vm11920_vm14, %v11163_v18 }
 0x142   :  { %10645 = vmatprep.mubr.f32.mxu0 %v11249_v26  ;;  %10693 = vmatprep.mubr.f32.mxu1 %v11249_v26 }
 0x143   :  { %v2385_v16 = vadd.f32 %v2384_v3, %v2382_v10  ;;  %10656 = vmatprep.subr.mxu0 %v11946_v54  ;;  %10704 = vmatprep.subr.mxu1 %v11948_v55 }
 0x144   :  { %10646 = vmatmul.mubr.f32.gmra.mrb[26].mxu0 %v11258_v29  ;;  %10694 = vmatmul.mubr.f32.gmra.mrb[26].mxu1 %v11258_v29 }
 0x145   :  { %v2386_v22 = vadd.f32 %v2385_v16, %v2383_v6  ;;  %10650 = vmatprep.mubr.f32.mxu0 %v11252_v27  ;;  %10698 = vmatprep.mubr.f32.mxu1 %v11252_v27 }
 0x147   :  { %v2387_v25 = vrot.slane %v2386_v22, 4 }
 0x148   :  { %10651 = vmatmul.mubr.f32.vlgmr.msra.gmra.mrb[24].mxu0 %v11255_v28  ;;  %10699 = vmatmul.mubr.f32.vlgmr.msra.gmra.mrb[24].mxu1 %v11255_v28 }
 0x149   :  { %v2388_v33 = vadd.f32 %v2387_v25, %v2386_v22  ;;  %10657 = vmatpush3.msra.mxu0 %v11946_v54  ;;  %10705 = vmatpush3.msra.mxu1 %v11948_v55 }
 0x14a   :  { %10653 = vmatprep.mubr.f32.mxu0 %v11265_v32  ;;  %10701 = vmatprep.mubr.f32.mxu1 %v11265_v32 }
 0x14b   :  { %v2389_v7 = vrot.slane %v2388_v33, 2  ;;  %10664 = vmatprep.subr.msk.mxu0 %vm11915_vm13, %v11163_v18  ;;  %10712 = vmatprep.subr.msk.mxu1 %vm11920_vm14, %v11163_v18 }
 0x14c   :  { %10654 = vmatmul.mubr.f32.gmra.mrb[26].mxu0 %v11272_v35  ;;  %10702 = vmatmul.mubr.f32.gmra.mrb[26].mxu1 %v11272_v35 }
 0x14d   :  { %v2390_v36 = vadd.f32 %v2389_v7, %v2388_v33  ;;  %10658 = vmatprep.mubr.f32.mxu0 %v11206_v11  ;;  %10706 = vmatprep.mubr.f32.mxu1 %v11206_v11 }
 0x14f   :  { %v2391_v37 = vrot.slane %v2390_v36, 1 }
 0x150   :  { %10659 = vmatmul.mubr.f32.vlgmr.msra.gmra.mrb[24].mxu0 %v11208_v12  ;;  %10707 = vmatmul.mubr.f32.vlgmr.msra.gmra.mrb[24].mxu1 %v11208_v12 }
 0x151   :  { %v2392_v46 = vadd.f32 %v2391_v37, %v2390_v36  ;;  %10665 = vmatpush3.msk.msra.mxu0 %vm11915_vm13, %v11163_v18  ;;  %10713 = vmatpush3.msk.msra.mxu1 %vm11920_vm14, %v11163_v18 }
 0x152   :  { %10661 = vmatprep.mubr.f32.mxu0 %v11210_v13  ;;  %10709 = vmatprep.mubr.f32.mxu1 %v11210_v13 }
 0x153   :  { %2393 = vst [vmem:[#allocation2 + $0x1] sm:$0x1] %v2392_v46  ;;  %10720 = vmatprep.subr.msk.mxu0 %vm12031_vm15, %v11163_v18  ;;  %10768 = vmatprep.subr.msk.mxu1 %vm12036_vm0, %v11163_v18 }
 0x154   :  { %10662 = vmatmul.mubr.f32.gmra.mrb[26].mxu0 %v11222_v17  ;;  %10710 = vmatmul.mubr.f32.gmra.mrb[26].mxu1 %v11222_v17 }
 0x155   :  { %10666 = vmatprep.mubr.f32.mxu0 %v11206_v11  ;;  %10714 = vmatprep.mubr.f32.mxu1 %v11206_v11 }
 0x158   :  { %10667 = vmatmul.mubr.f32.vlgmr.msra.gmra.mrb[24].mxu0 %v11208_v12  ;;  %10715 = vmatmul.mubr.f32.vlgmr.msra.gmra.mrb[24].mxu1 %v11208_v12 }
 0x159   :  { %10721 = vmatpush3.msk.msra.mxu0 %vm12031_vm15, %v11163_v18  ;;  %10769 = vmatpush3.msk.msra.mxu1 %vm12036_vm0, %v11163_v18 }
 0x15a   :  { %10669 = vmatprep.mubr.f32.mxu0 %v11210_v13  ;;  %10717 = vmatprep.mubr.f32.mxu1 %v11210_v13 }
 0x15b   :  { %10728 = vmatprep.subr.mxu0 %v8421_v42  ;;  %10776 = vmatprep.subr.mxu1 %v8996_v48 }
 0x15c   :  { %10670 = vmatmul.mubr.f32.gmra.mrb[26].mxu0 %v11222_v17  ;;  %10718 = vmatmul.mubr.f32.gmra.mrb[26].mxu1 %v11222_v17 }
 0x15d   :  { %10722 = vmatprep.mubr.f32.mxu0 %v11278_v39  ;;  %10770 = vmatprep.mubr.f32.mxu1 %v11278_v39 }
 0x160   :  { %10723 = vmatmul.mubr.f32.vlgmr.msra.gmra.mrb[28].mxu0 %v11280_v40  ;;  %10771 = vmatmul.mubr.f32.vlgmr.msra.gmra.mrb[28].mxu1 %v11280_v40 }
 0x161   :  { %10729 = vmatpush3.msra.mxu0 %v8421_v42  ;;  %10777 = vmatpush3.msra.mxu1 %v8996_v48 }
 0x162   :  { %10725 = vmatprep.mubr.f32.mxu0 %v11286_v44  ;;  %10773 = vmatprep.mubr.f32.mxu1 %v11286_v44 }
 0x163   :  { %10736 = vmatprep.subr.mxu0 %v8418_v34  ;;  %10784 = vmatprep.subr.mxu1 %v8993_v21 }
 0x164   :  { %10726 = vmatmul.mubr.f32.gmra.mrb[30].mxu0 %v11290_v45  ;;  %10774 = vmatmul.mubr.f32.gmra.mrb[30].mxu1 %v11290_v45 }
 0x165   :  { %10730 = vmatprep.mubr.f32.mxu0 %v11206_v11  ;;  %10778 = vmatprep.mubr.f32.mxu1 %v11206_v11 }
 0x168   :  { %10731 = vmatmul.mubr.f32.vlgmr.msra.gmra.mrb[28].mxu0 %v11208_v12  ;;  %10779 = vmatmul.mubr.f32.vlgmr.msra.gmra.mrb[28].mxu1 %v11208_v12 }
 0x169   :  { %10737 = vmatpush3.msra.mxu0 %v8418_v34  ;;  %10785 = vmatpush3.msra.mxu1 %v8993_v21 }
 0x16a   :  { %10733 = vmatprep.mubr.f32.mxu0 %v11210_v13  ;;  %10781 = vmatprep.mubr.f32.mxu1 %v11210_v13 }
 0x16b   :  { %v10284_v39 = vpop.f32.mrb[8].mxu0  ;;  %v10332_v40 = vpop.f32.mrb[8].mxu1  ;;  %10744 = vmatprep.subr.msk.mxu0 %vm12031_vm15, %v11163_v18  ;;  %10792 = vmatprep.subr.msk.mxu1 %vm12036_vm0, %v11163_v18 }
 0x16c   :  { %v3561_v44 = vmul.f32 %v10332_v40, %v10284_v39  ;;  %v2963_v45 = vpop.f32.mrb[9].mxu0  ;;  %v3538_v49 = vpop.f32.mrb[9].mxu1  ;;  %10734 = vmatmul.mubr.f32.gmra.mrb[30].mxu0 %v11222_v17  ;;  %10782 = vmatmul.mubr.f32.gmra.mrb[30].mxu1 %v11222_v17 }
 0x16d   :  { %v3560_v50 = vmul.f32 %v3538_v49, %v2963_v45  ;;  %10738 = vmatprep.mubr.f32.mxu0 %v11231_v19  ;;  %10786 = vmatprep.mubr.f32.mxu1 %v11231_v19 }
 0x16f   :  { %v3564_v51 = vadd.f32 %v3561_v44, %v3560_v50  ;;  %v10287_v52 = vpop.f32.mrb[10].mxu0  ;;  %v10335_v53 = vpop.f32.mrb[10].mxu1 }
 0x170   :  { %v3563_v54 = vmul.f32 %v10335_v53, %v10287_v52  ;;  %v2975_v55 = vpop.f32.mrb[11].mxu0  ;;  %v3550_v56 = vpop.f32.mrb[11].mxu1  ;;  %10739 = vmatmul.mubr.f32.vlgmr.msra.gmra.mrb[28].mxu0 %v11234_v20  ;;  %10787 = vmatmul.mubr.f32.vlgmr.msra.gmra.mrb[28].mxu1 %v11234_v20 }
 0x171   :  { %v3562_v57 = vmul.f32 %v3550_v56, %v2975_v55  ;;  %10745 = vmatpush3.msk.msra.mxu0 %vm12031_vm15, %v11163_v18  ;;  %10793 = vmatpush3.msk.msra.mxu1 %vm12036_vm0, %v11163_v18 }
 0x172   :  { %10741 = vmatprep.mubr.f32.mxu0 %v11249_v26  ;;  %10789 = vmatprep.mubr.f32.mxu1 %v11249_v26 }
 0x173   :  { %v3565_v19 = vadd.f32 %v3564_v51, %v3562_v57  ;;  %10752 = vmatprep.subr.mxu0 %v12062_v38  ;;  %10800 = vmatprep.subr.mxu1 %v12064_v43 }
 0x174   :  { %10742 = vmatmul.mubr.f32.gmra.mrb[30].mxu0 %v11258_v29  ;;  %10790 = vmatmul.mubr.f32.gmra.mrb[30].mxu1 %v11258_v29 }
 0x175   :  { %v3566_v20 = vadd.f32 %v3565_v19, %v3563_v54  ;;  %10746 = vmatprep.mubr.f32.mxu0 %v11252_v27  ;;  %10794 = vmatprep.mubr.f32.mxu1 %v11252_v27 }
 0x177   :  { %v3567_v58 = vrot.slane %v3566_v20, 4 }
 0x178   :  { %10747 = vmatmul.mubr.f32.vlgmr.msra.gmra.mrb[28].mxu0 %v11255_v28  ;;  %10795 = vmatmul.mubr.f32.vlgmr.msra.gmra.mrb[28].mxu1 %v11255_v28 }
 0x179   :  { %v3568_v26 = vadd.f32 %v3567_v58, %v3566_v20  ;;  %10753 = vmatpush3.msra.mxu0 %v12062_v38  ;;  %10801 = vmatpush3.msra.mxu1 %v12064_v43 }
 0x17a   :  { %10749 = vmatprep.mubr.f32.mxu0 %v11265_v32  ;;  %10797 = vmatprep.mubr.f32.mxu1 %v11265_v32 }
 0x17b   :  { %v3569_v29 = vrot.slane %v3568_v26, 2  ;;  %10760 = vmatprep.subr.msk.mxu0 %vm12031_vm15, %v11163_v18  ;;  %10808 = vmatprep.subr.msk.mxu1 %vm12036_vm0, %v11163_v18 }
 0x17c   :  { %10750 = vmatmul.mubr.f32.gmra.mrb[30].mxu0 %v11272_v35  ;;  %10798 = vmatmul.mubr.f32.gmra.mrb[30].mxu1 %v11272_v35 }
 0x17d   :  { %v3570_v27 = vadd.f32 %v3569_v29, %v3568_v26  ;;  %10754 = vmatprep.mubr.f32.mxu0 %v11206_v11  ;;  %10802 = vmatprep.mubr.f32.mxu1 %v11206_v11 }
 0x17f   :  { %v3571_v28 = vrot.slane %v3570_v27, 1 }
 0x180   :  { %10755 = vmatmul.mubr.f32.vlgmr.msra.gmra.mrb[28].mxu0 %v11208_v12  ;;  %10803 = vmatmul.mubr.f32.vlgmr.msra.gmra.mrb[28].mxu1 %v11208_v12 }
 0x181   :  { %v3572_v32 = vadd.f32 %v3571_v28, %v3570_v27  ;;  %10761 = vmatpush3.msk.msra.mxu0 %vm12031_vm15, %v11163_v18  ;;  %10809 = vmatpush3.msk.msra.mxu1 %vm12036_vm0, %v11163_v18 }
 0x182   :  { %10757 = vmatprep.mubr.f32.mxu0 %v11210_v13  ;;  %10805 = vmatprep.mubr.f32.mxu1 %v11210_v13 }
 0x183   :  { %3573 = vst [vmem:[#allocation2 + $0x2] sm:$0x1] %v3572_v32 }
 0x184   :  { %10758 = vmatmul.mubr.f32.gmra.mrb[30].mxu0 %v11222_v17  ;;  %10806 = vmatmul.mubr.f32.gmra.mrb[30].mxu1 %v11222_v17 }
 0x185   :  { %10762 = vmatprep.mubr.f32.mxu0 %v11206_v11  ;;  %10810 = vmatprep.mubr.f32.mxu1 %v11206_v11 }
 0x188   :  { %10763 = vmatmul.mubr.f32.vlgmr.msra.gmra.mrb[28].mxu0 %v11208_v12  ;;  %10811 = vmatmul.mubr.f32.vlgmr.msra.gmra.mrb[28].mxu1 %v11208_v12 }
 0x189   :  { %10765 = vmatprep.mubr.f32.mxu0 %v11210_v13  ;;  %10813 = vmatprep.mubr.f32.mxu1 %v11210_v13 }
 0x18c   :  { %10766 = vmatmul.mubr.f32.gmra.mrb[30].mxu0 %v11222_v17  ;;  %10814 = vmatmul.mubr.f32.gmra.mrb[30].mxu1 %v11222_v17 }
 0x19b   :  { %v10380_v18 = vpop.f32.mrb[12].mxu0  ;;  %v10428_v35 = vpop.f32.mrb[12].mxu1 }
 0x19c   :  { %v4741_v59 = vmul.f32 %v10428_v35, %v10380_v18  ;;  %v4143_v60 = vpop.f32.mrb[13].mxu0  ;;  %v4718_v61 = vpop.f32.mrb[13].mxu1 }
 0x19d   :  { %v4740_v62 = vmul.f32 %v4718_v61, %v4143_v60 }
 0x19f   :  { %v4744_v63 = vadd.f32 %v4741_v59, %v4740_v62  ;;  %v10383_v11 = vpop.f32.mrb[14].mxu0  ;;  %v10431_v0 = vpop.f32.mrb[14].mxu1 }
 0x1a0   :  { %v4743_v1 = vmul.f32 %v10431_v0, %v10383_v11  ;;  %v4155_v2 = vpop.f32.mrb[15].mxu0  ;;  %v4730_v12 = vpop.f32.mrb[15].mxu1 }
 0x1a1   :  { %v4742_v3 = vmul.f32 %v4730_v12, %v4155_v2 }
 0x1a3   :  { %v4745_v4 = vadd.f32 %v4744_v63, %v4742_v3 }
 0x1a5   :  { %v4746_v5 = vadd.f32 %v4745_v4, %v4743_v1 }
 0x1a7   :  { %v4747_v13 = vrot.slane %v4746_v5, 4 }
 0x1a9   :  { %v4748_v6 = vadd.f32 %v4747_v13, %v4746_v5 }
 0x1ab   :  { %v4749_v8 = vrot.slane %v4748_v6, 2 }
 0x1ad   :  { %v4750_v9 = vadd.f32 %v4749_v8, %v4748_v6 }
 0x1af   :  { %v4751_v17 = vrot.slane %v4750_v9, 1 }
 0x1b1   :  { %v4752_v10 = vadd.f32 %v4751_v17, %v4750_v9 }
 0x1b3   :  { %4753 = vst [vmem:[#allocation2 + $0x3] sm:$0x1] %v4752_v10 }
 0x1cb   :  { %v10476_v14 = vpop.f32.mrb[16].mxu0  ;;  %v10524_v15 = vpop.f32.mrb[16].mxu1 }
 0x1cc   :  { %v5921_v16 = vmul.f32 %v10524_v15, %v10476_v14  ;;  %v5323_v22 = vpop.f32.mrb[17].mxu0  ;;  %v5898_v23 = vpop.f32.mrb[17].mxu1 }
 0x1cd   :  { %v5920_v24 = vmul.f32 %v5898_v23, %v5323_v22 }
 0x1cf   :  { %v5924_v25 = vadd.f32 %v5921_v16, %v5920_v24  ;;  %v10479_v30 = vpop.f32.mrb[18].mxu0  ;;  %v10527_v31 = vpop.f32.mrb[18].mxu1 }
 0x1d0   :  { %v5923_v33 = vmul.f32 %v10527_v31, %v10479_v30  ;;  %v5335_v7 = vpop.f32.mrb[19].mxu0  ;;  %v5910_v34 = vpop.f32.mrb[19].mxu1 }
 0x1d1   :  { %v5922_v21 = vmul.f32 %v5910_v34, %v5335_v7 }
 0x1d3   :  { %v5925_v36 = vadd.f32 %v5924_v25, %v5922_v21 }
 0x1d5   :  { %v5926_v37 = vadd.f32 %v5925_v36, %v5923_v33 }
 0x1d7   :  { %v5927_v38 = vrot.slane %v5926_v37, 4 }
 0x1d9   :  { %v5928_v43 = vadd.f32 %v5927_v38, %v5926_v37 }
 0x1db   :  { %v5929_v46 = vrot.slane %v5928_v43, 2 }
 0x1dd   :  { %v5930_v41 = vadd.f32 %v5929_v46, %v5928_v43 }
 0x1df   :  { %v5931_v47 = vrot.slane %v5930_v41, 1 }
 0x1e1   :  { %v5932_v42 = vadd.f32 %v5931_v47, %v5930_v41 }
 0x1e3   :  { %5933 = vst [vmem:[#allocation2 + $0x4] sm:$0x1] %v5932_v42 }
 0x1fb   :  { %v10572_v48 = vpop.f32.mrb[20].mxu0  ;;  %v10620_v39 = vpop.f32.mrb[20].mxu1 }
 0x1fc   :  { %v7101_v40 = vmul.f32 %v10620_v39, %v10572_v48  ;;  %v6503_v44 = vpop.f32.mrb[21].mxu0  ;;  %v7078_v45 = vpop.f32.mrb[21].mxu1 }
 0x1fd   :  { %v7100_v49 = vmul.f32 %v7078_v45, %v6503_v44 }
 0x1ff   :  { %v7104_v50 = vadd.f32 %v7101_v40, %v7100_v49  ;;  %v10575_v51 = vpop.f32.mrb[22].mxu0  ;;  %v10623_v52 = vpop.f32.mrb[22].mxu1 }
 0x200   :  { %v7103_v53 = vmul.f32 %v10623_v52, %v10575_v51  ;;  %v6515_v54 = vpop.f32.mrb[23].mxu0  ;;  %v7090_v55 = vpop.f32.mrb[23].mxu1 }
 0x201   :  { %v7102_v56 = vmul.f32 %v7090_v55, %v6515_v54 }
 0x203   :  { %v7105_v57 = vadd.f32 %v7104_v50, %v7102_v56 }
 0x205   :  { %v7106_v19 = vadd.f32 %v7105_v57, %v7103_v53 }
 0x207   :  { %v7107_v20 = vrot.slane %v7106_v19, 4 }
 0x209   :  { %v7108_v58 = vadd.f32 %v7107_v20, %v7106_v19 }
 0x20b   :  { %v7109_v26 = vrot.slane %v7108_v58, 2 }
 0x20d   :  { %v7110_v29 = vadd.f32 %v7109_v26, %v7108_v58 }
 0x20f   :  { %v7111_v27 = vrot.slane %v7110_v29, 1 }
 0x211   :  { %v7112_v28 = vadd.f32 %v7111_v27, %v7110_v29 }
 0x213   :  { %7113 = vst [vmem:[#allocation2 + $0x5] sm:$0x1] %v7112_v28 }
 0x22b   :  { %v10668_v32 = vpop.f32.mrb[24].mxu0  ;;  %v10716_v18 = vpop.f32.mrb[24].mxu1 }
 0x22c   :  { %v8281_v35 = vmul.f32 %v10716_v18, %v10668_v32  ;;  %v7683_v59 = vpop.f32.mrb[25].mxu0  ;;  %v8258_v60 = vpop.f32.mrb[25].mxu1 }
 0x22d   :  { %v8280_v61 = vmul.f32 %v8258_v60, %v7683_v59 }
 0x22f   :  { %v8284_v62 = vadd.f32 %v8281_v35, %v8280_v61  ;;  %v10671_v63 = vpop.f32.mrb[26].mxu0  ;;  %v10719_v11 = vpop.f32.mrb[26].mxu1 }
 0x230   :  { %v8283_v0 = vmul.f32 %v10719_v11, %v10671_v63  ;;  %v7695_v1 = vpop.f32.mrb[27].mxu0  ;;  %v8270_v2 = vpop.f32.mrb[27].mxu1 }
 0x231   :  { %v8282_v12 = vmul.f32 %v8270_v2, %v7695_v1 }
 0x233   :  { %v8285_v3 = vadd.f32 %v8284_v62, %v8282_v12 }
 0x235   :  { %v8286_v4 = vadd.f32 %v8285_v3, %v8283_v0 }
 0x237   :  { %v8287_v5 = vrot.slane %v8286_v4, 4 }
 0x239   :  { %v8288_v13 = vadd.f32 %v8287_v5, %v8286_v4 }
 0x23b   :  { %v8289_v6 = vrot.slane %v8288_v13, 2 }
 0x23d   :  { %v8290_v8 = vadd.f32 %v8289_v6, %v8288_v13 }
 0x23f   :  { %v8291_v9 = vrot.slane %v8290_v8, 1 }
 0x241   :  { %v8292_v17 = vadd.f32 %v8291_v9, %v8290_v8 }
 0x243   :  { %8293 = vst [vmem:[#allocation2 + $0x6] sm:$0x1] %v8292_v17 }
 0x25b   :  { %v10764_v10 = vpop.f32.mrb[28].mxu0  ;;  %v10812_v14 = vpop.f32.mrb[28].mxu1 }
 0x25c   :  { %v9461_v15 = vmul.f32 %v10812_v14, %v10764_v10  ;;  %v8863_v16 = vpop.f32.mrb[29].mxu0  ;;  %v9438_v22 = vpop.f32.mrb[29].mxu1 }
 0x25d   :  { %v9460_v23 = vmul.f32 %v9438_v22, %v8863_v16 }
 0x25f   :  { %v9464_v24 = vadd.f32 %v9461_v15, %v9460_v23  ;;  %v10767_v25 = vpop.f32.mrb[30].mxu0  ;;  %v10815_v30 = vpop.f32.mrb[30].mxu1 }
 0x260   :  { %v9463_v31 = vmul.f32 %v10815_v30, %v10767_v25  ;;  %v8875_v33 = vpop.f32.mrb[31].mxu0  ;;  %v9450_v7 = vpop.f32.mrb[31].mxu1 }
 0x261   :  { %v9462_v34 = vmul.f32 %v9450_v7, %v8875_v33 }
 0x263   :  { %v9465_v21 = vadd.f32 %v9464_v24, %v9462_v34 }
 0x265   :  { %v9466_v36 = vadd.f32 %v9465_v21, %v9463_v31 }
 0x267   :  { %v9467_v37 = vrot.slane %v9466_v36, 4 }
 0x269   :  { %v9468_v38 = vadd.f32 %v9467_v37, %v9466_v36 }
 0x26b   :  { %v9469_v43 = vrot.slane %v9468_v38, 2 }
 0x26d   :  { %v9470_v46 = vadd.f32 %v9469_v43, %v9468_v38 }
 0x26f   :  { %v9471_v41 = vrot.slane %v9470_v46, 1 }
 0x271   :  { %v9472_v47 = vadd.f32 %v9471_v41, %v9470_v46 }
 0x273   :  { %9473 = vst [vmem:[#allocation2 + $0x7] sm:$0x1] %v9472_v47 }
 0x274   :  { %11150 = shalt.err (!%p11147_p4)
}
 0x275   :  { %s11151_s26 = scalar_lea.hbm %s12191_s3, 128 }
 0x276   :  { %p11152_p5 = scmp.ne.s32.totalorder %s12191_s3, %s11151_s26  ;;  %p11155_p6 = scmp.lt.u32.totalorder %s11151_s26, %s12191_s3 }
 0x278   :  { %p11157_p7 = pnand %p11155_p6, %p11152_p5 }
 0x27a   :  { %11160 = shalt.err (!%p11157_p7)
}
 0x27b   :  { %9483 = dma.vmem_to_hbm [thread:$0]  %s9481_s1, 128, %s12191_s3, [#allocation3]  }
 0x27c   :  { %11161 = dma.done.wait [#allocation3], 128  }
 0x27d   :  { %11162 = vsyncadd [#allocation3], 4294967168 }
 0x27e   :  { %9487 = vsyncpa [#allocation3], 1 }

</bundles_post_ra>
